<compile_context>
chip_gen: v7x
topology: tpu7x:2x2x1
jax: 0.10.0
libtpu: 0.0.40
codegen_flags: <defaults>
</compile_context>

<pallas_src>
import functools

import jax
import jax.numpy as jnp
from jax.experimental import pallas as pl
from jax.experimental.pallas import tpu as pltpu

DH = 16              # hidden-state dimension dh
ALPHA = 0.1          # decay coefficient alpha

# --- static packed layout (independent of dh as long as dh + 10 <= 64) -------
X_LANES = 128        # input slab width: [yE1 | 0.. | yE2 | 0..]
X_HALF = 64          # yE2 starts at lane 64

# net : (dh+10)->128->256->256->128->dh, padded (K, N) per layer
NET_KN = ((128, 128), (128, 256), (256, 256), (256, 128), (128, 128))
NET_OFFS = (0, 128, 256, 512, 768)
W_NET_ROWS = 896     # sum of padded K

# netornt : (dh+10)->32->64->32->1, kept at a uniform 128x128 pad (tiny anyway,
# keeps every intermediate activation a full 128-lane tensor — simplest lowering)
ORNT_KN = ((128, 128), (128, 128), (128, 128), (128, 128))
ORNT_OFFS = (0, 128, 256, 384)
W_ORNT_ROWS = 512

N_NET = 5
N_ORNT = 4
B_ROWS = 8 * (N_NET + N_ORNT)   # bias slab: one 8-aligned row per layer


def _net_sizes(dh):
    return [(dh + 10, 128), (128, 256), (256, 256), (256, 128), (128, dh)]


def _ornt_sizes(dh):
    return [(dh + 10, 32), (32, 64), (64, 32), (32, 1)]


# ----------------------------------------------------------------------------
# External time-dependent fields. Efunc/Qfunc are globals of the original
# training script and are not defined in the module; deterministic synthetic
# versions with the right shape (9-vector per time point) are used here.
# TODO(synk): replace Efunc/Qfunc with the real field definitions if available.
# ----------------------------------------------------------------------------
def Efunc(t):
    t = jnp.asarray(t, jnp.float32)
    i = jnp.arange(9, dtype=jnp.float32)
    return jnp.sin(0.3 * (i + 1.0) * t[..., None] + 0.1 * i)


def Qfunc(t):
    t = jnp.asarray(t, jnp.float32)
    i = jnp.arange(9, dtype=jnp.float32)
    return jnp.cos(0.2 * (i + 1.0) * t[..., None] + 0.05 * i)


# ----------------------------------------------------------------------------
# Pallas kernel: both MLPs + `- alpha * state` for one batch block.
# ----------------------------------------------------------------------------
def _ode3_kernel(x_ref, w_net_ref, w_ornt_ref, b_ref, out_ref, *, alpha):
    """x_ref      : (BLK, 128) f32.  lanes 0:dh+10 = yE1, 64:64+dh+10 = yE2.
       w_net_ref  : (896, 256) bf16. flat per-layer slab, zero-padded.
       w_ornt_ref : (512, 128) bf16. flat per-layer slab; final layer's single
                    output column sits at lane dh.
       b_ref      : (72, 256)  f32.  bias of layer j at row 8*j.
       out_ref    : (BLK, 128) f32.  lanes 0:dh = hRHS, lane dh = thetaRHS.
    """
    x = x_ref[...]                                           # (BLK, 128) f32

    def mlp(w_ref, kn, offs, bias_row0, act):
        for i, (kin, nout) in enumerate(kn):
            off = offs[i]                                    # static
            w = w_ref[off:off + kin, :nout]                  # bf16, VMEM-resident
            b = b_ref[8 * (bias_row0 + i):8 * (bias_row0 + i) + 1, :nout]  # f32
            act = jnp.dot(act.astype(jnp.bfloat16), w,
                          preferred_element_type=jnp.float32) + b
            if i < len(kn) - 1:
                act = jnp.maximum(act, 0.0)
        return act

    # hRHS (raw) in lanes 0:dh, zeros elsewhere (zero-padded weights/bias).
    a = mlp(w_net_ref, NET_KN, NET_OFFS, 0, x)
    # thetaRHS (raw) at lane dh, zeros elsewhere.
    z = mlp(w_ornt_ref, ORNT_KN, ORNT_OFFS, N_NET, x)

    # Lanes 0:dh of x hold h, lane dh holds ornt -> lanes 0:dh+1 of the output
    # are exactly the module's RHS.  Lanes beyond dh are garbage but the
    # wrapper slices them off, so no masking needed.
    out_ref[...] = a + z - alpha * x


# ----------------------------------------------------------------------------
# Parameter creation / packing.
# ----------------------------------------------------------------------------
def make_params(key, dh=DH):
    """Per-layer (W, b) lists matching nn.init.normal_(std=0.1), zero bias."""
    sizes = _net_sizes(dh) + _ornt_sizes(dh)
    keys = jax.random.split(key, len(sizes))
    layers = [(0.1 * jax.random.normal(k, s, jnp.float32),
               jnp.zeros((s[1],), jnp.float32)) for k, s in zip(keys, sizes)]
    return layers[:N_NET], layers[N_NET:]


def pack_params(net_layers, ornt_layers, dh=DH):
    """Pack weights into two bf16 slabs + one f32 bias slab."""
    assert dh + 10 <= X_HALF, "layout assumes dh + 10 <= 64"

    w_net = jnp.zeros((W_NET_ROWS, 256), jnp.float32)
    for i, (w, _) in enumerate(net_layers):
        fin, fout = w.shape
        r0 = NET_OFFS[i]                         # layer 0: rows 0:dh+10 map yE1
        w_net = w_net.at[r0:r0 + fin, :fout].set(w)
    w_net = w_net.astype(jnp.bfloat16)

    w_ornt = jnp.zeros((W_ORNT_ROWS, 128), jnp.float32)
    for i, (w, _) in enumerate(ornt_layers):
        fin, fout = w.shape
        r0 = ORNT_OFFS[i] + (X_HALF if i == 0 else 0)   # yE2 lives at lanes 64:...
        c0 = dh if i == N_ORNT - 1 else 0               # 1-wide output -> lane dh
        w_ornt = w_ornt.at[r0:r0 + fin, c0:c0 + fout].set(w)
    w_ornt = w_ornt.astype(jnp.bfloat16)

    b_slab = jnp.zeros((B_ROWS, 256), jnp.float32)
    for i, (_, b) in enumerate(net_layers):
        b_slab = b_slab.at[8 * i, :b.shape[0]].set(b)
    for i, (_, b) in enumerate(ornt_layers):
        c0 = dh if i == N_ORNT - 1 else 0
        b_slab = b_slab.at[8 * (N_NET + i), c0:c0 + b.shape[0]].set(b)
    return w_net, w_ornt, b_slab


def _pick_blk_b(B):
    # >=2 grid steps per TensorCore on v7x for B >= 512; 256-row blocks only for
    # very large batches (fills the 256-wide MXU on v6e/v7x while keeping the
    # pipeline >= 2 steps/core).  Small-M path for the scalar ODE interface.
    if B >= 1024:
        return 256
    if B >= 128:
        return 128
    return max(8, ((B + 7) // 8) * 8)


# ----------------------------------------------------------------------------
# Batched forward (preamble + kernel fused under one jit).
# ----------------------------------------------------------------------------
@functools.partial(jax.jit, static_argnames=("dh", "alpha"))
def ode3_rhs_batched(ts, ys, w_net, w_ornt, b_slab, *, dh=DH, alpha=ALPHA):
    """Batched SciPyODE3.forward: ts (B,), ys (B, dh+1) -> (B, dh+1)."""
    assert dh + 10 <= X_HALF
    ys = ys.astype(jnp.float32)
    ts = jnp.asarray(ts, jnp.float32)
    B = ys.shape[0]
    hp = jax.lax.Precision.HIGHEST

    # --- scalar trig / 3x3 preamble, vectorized over the batch ---------------
    ornt = ys[:, -1]
    E = Efunc(ts)                                   # (B, 9)
    Q = Qfunc(ts)                                   # (B, 9)
    thetaQ = jnp.arctan2(Q[:, 1], Q[:, 0])
    phaseQ = -ornt / 2.0 + thetaQ
    c, s = jnp.cos(phaseQ), jnp.sin(phaseQ)
    z0 = jnp.zeros_like(c)
    RQ = jnp.stack([jnp.stack([c, -s, z0], -1),
                    jnp.stack([s, c, z0], -1),
                    jnp.stack([z0, z0, z0], -1)], axis=-2)        # (B, 3, 3)
    E33 = E.reshape(B, 3, 3)
    Q33 = Q.reshape(B, 3, 3)
    E1 = jnp.einsum("bji,bjk,bkl->bil", RQ, E33, RQ,
                    precision=hp).reshape(B, 9)                   # RQ^T E RQ
    E2 = jnp.einsum("bij,bjk,blk->bil", Q33, E33, Q33,
                    precision=hp).reshape(B, 9)                   # Q  E Q^T

    # --- one 128-lane input slab: [ys | E1 | 0.. | ys | E2 | 0..] -------------
    pad = X_HALF - (dh + 10)
    zpad = jnp.zeros((B, pad), jnp.float32)
    x = jnp.concatenate([ys, E1, zpad, ys, E2, zpad], axis=1)     # (B, 128)

    blk = _pick_blk_b(B)
    Bp = ((B + blk - 1) // blk) * blk
    if Bp != B:
        x = jnp.pad(x, ((0, Bp - B), (0, 0)))

    kernel = functools.partial(_ode3_kernel, alpha=float(alpha))

    out = pl.pallas_call(
        kernel,
        out_shape=jax.ShapeDtypeStruct((Bp, X_LANES), jnp.float32),
        grid=(Bp // blk,),
        in_specs=[
            pl.BlockSpec((blk, X_LANES), lambda i: (i, 0)),
            # Constant index maps: weight/bias slabs are DMA'd once and stay
            # resident in VMEM across all batch blocks (~650 KiB total).
            pl.BlockSpec((W_NET_ROWS, 256), lambda i: (0, 0)),
            pl.BlockSpec((W_ORNT_ROWS, 128), lambda i: (0, 0)),
            pl.BlockSpec((B_ROWS, 256), lambda i: (0, 0)),
        ],
        out_specs=pl.BlockSpec((blk, X_LANES), lambda i: (i, 0)),
        compiler_params=pltpu.CompilerParams(
            dimension_semantics=("parallel",)),
    )(x, w_net, w_ornt, b_slab)

    return out[:B, :dh + 1]


def scipy_ode3_forward(t, y, w_net, w_ornt, b_slab, *, dh=DH, alpha=ALPHA):
    """Original module semantics: scalar t, y (dh+1,) -> RHS (dh+1,).
    Uses the small-M (8-row) kernel variant; batch RK stages / trajectories
    into ode3_rhs_batched for throughput."""
    t = jnp.asarray(t, jnp.float32).reshape(1)
    y = jnp.asarray(y, jnp.float32).reshape(1, -1)
    return ode3_rhs_batched(t, y, w_net, w_ornt, b_slab, dh=dh, alpha=alpha)[0]


# ----------------------------------------------------------------------------
# Pure-JAX reference (correctness check only).
# ----------------------------------------------------------------------------
def _reference_forward(t, y, net_layers, ornt_layers, dh=DH, alpha=ALPHA,
                       matmul_dtype=jnp.float32):
    y = y.astype(jnp.float32)
    ornt = y[-1]
    E = Efunc(t)
    Q = Qfunc(t)
    thetaQ = jnp.arctan2(Q[1], Q[0])
    phaseQ = -ornt / 2.0 + thetaQ
    c, s = jnp.cos(phaseQ), jnp.sin(phaseQ)
    z0 = jnp.zeros_like(c)
    RQ = jnp.stack([jnp.stack([c, -s, z0]),
                    jnp.stack([s, c, z0]),
                    jnp.stack([z0, z0, z0])])
    E33 = E.reshape(3, 3)
    Q33 = Q.reshape(3, 3)
    hp = jax.lax.Precision.HIGHEST
    E1 = jnp.einsum("ji,jk,kl->il", RQ, E33, RQ, precision=hp).reshape(9)
    E2 = jnp.einsum("ij,jk,lk->il", Q33, E33, Q33, precision=hp).reshape(9)
    yE1 = jnp.concatenate([y, E1])
    yE2 = jnp.concatenate([y, E2])

    def run(layers, a):
        for i, (w, b) in enumerate(layers):
            a = jnp.dot(a.astype(matmul_dtype), w.astype(matmul_dtype),
                        preferred_element_type=jnp.float32) + b
            if i < len(layers) - 1:
                a = jnp.maximum(a, 0.0)
        return a

    h_rhs = run(net_layers, yE1) - alpha * y[:-1]
    th_rhs = run(ornt_layers, yE2) - alpha * ornt
    return jnp.concatenate([h_rhs, th_rhs])


if __name__ == "__main__":
    key = jax.random.PRNGKey(0)
    k_p, k_y, k_t = jax.random.split(key, 3)

    net_layers, ornt_layers = make_params(k_p, DH)
    w_net, w_ornt, b_slab = pack_params(net_layers, ornt_layers, DH)

    B = 512                                   # four 128-row grid blocks
    ys = jax.random.normal(k_y, (B, DH + 1), jnp.float32)
    ts = jax.random.uniform(k_t, (B,), jnp.float32, minval=0.0, maxval=2.0)

    rhs = ode3_rhs_batched(ts, ys, w_net, w_ornt, b_slab, dh=DH, alpha=ALPHA)
    rhs = jax.block_until_ready(rhs)
    assert rhs.shape == (B, DH + 1)

    # Tight check vs. a bf16-matmul-matched reference (same arithmetic regime).
    ref_bf16 = jax.vmap(
        lambda t, y: _reference_forward(t, y, net_layers, ornt_layers, DH,
                                        ALPHA, jnp.bfloat16))(ts, ys)
    assert jnp.allclose(rhs, ref_bf16, atol=5e-3, rtol=5e-3), \
        float(jnp.abs(rhs - ref_bf16).max())

    # Loose sanity check vs. the f32 reference (bf16 MXU rounding is the only
    # difference; re-validate against the ODE solver's tolerance downstream).
    ref_f32 = jax.vmap(
        lambda t, y: _reference_forward(t, y, net_layers, ornt_layers, DH,
                                        ALPHA, jnp.float32))(ts, ys)
    assert jnp.allclose(rhs, ref_f32, atol=5e-2, rtol=5e-2), \
        float(jnp.abs(rhs - ref_f32).max())

    # Original module interface: single (t, y) -> (dh+1,)  (small-M kernel path)
    single = scipy_ode3_forward(float(ts[0]), ys[0], w_net, w_ornt, b_slab)
    single = jax.block_until_ready(single)
    assert single.shape == (DH + 1,)
    assert jnp.allclose(single, ref_bf16[0], atol=5e-3, rtol=5e-3)

    print("KERNEL_OK")
</pallas_src>

<mosaic_0001>
module attributes {stable_mosaic.version = 11 : i64} {
  func.func @_ode3_kernel(%arg0: i32, %arg1: memref<128x128xf32, #tpu.memory_space<vmem>>, %arg2: memref<896x256xbf16, #tpu.memory_space<vmem>>, %arg3: memref<512x128xbf16, #tpu.memory_space<vmem>>, %arg4: memref<72x256xf32, #tpu.memory_space<vmem>>, %arg5: memref<128x128xf32, #tpu.memory_space<vmem>>) attributes {dimension_semantics = [#tpu.dimension_semantics<parallel>], iteration_bounds = array<i64: 4>, scalar_prefetch = 0 : i64, scratch_operands = 0 : i64, tpu.core_type = #tpu.core_type<tc>, window_params = [{transform_indices = @transform_0, window_bounds = array<i64: 128, 128>}, {pipeline_mode = #tpu.pipeline_mode<synchronous>, transform_indices = @transform_1, window_bounds = array<i64: 896, 256>}, {pipeline_mode = #tpu.pipeline_mode<synchronous>, transform_indices = @transform_2, window_bounds = array<i64: 512, 128>}, {pipeline_mode = #tpu.pipeline_mode<synchronous>, transform_indices = @transform_3, window_bounds = array<i64: 72, 256>}, {transform_indices = @transform_4, window_bounds = array<i64: 128, 128>}]} {
    %c0 = arith.constant 0 : index
    %c0_0 = arith.constant 0 : index
    %0 = vector.load %arg1[%c0, %c0_0] : memref<128x128xf32, #tpu.memory_space<vmem>>, vector<128x128xf32>
    %c0_1 = arith.constant 0 : index
    %c0_2 = arith.constant 0 : index
    %1 = vector.load %arg2[%c0_1, %c0_2] : memref<896x256xbf16, #tpu.memory_space<vmem>>, vector<128x128xbf16>
    %c0_3 = arith.constant 0 : index
    %c0_4 = arith.constant 0 : index
    %2 = vector.load %arg4[%c0_3, %c0_4] : memref<72x256xf32, #tpu.memory_space<vmem>>, vector<1x128xf32>
    %3 = arith.truncf %0 : vector<128x128xf32> to vector<128x128xbf16>
    %cst = arith.constant dense<0.000000e+00> : vector<128x128xf32>
    %4 = tpu.matmul %3, %1, %cst {dimension_numbers = #tpu.dot_dimension_numbers<[1], [0], [0], [1], [0, 0, 1, 1], [], []>} : vector<128x128xbf16>, vector<128x128xbf16>, vector<128x128xf32> -> vector<128x128xf32>
    %5 = vector.broadcast %2 : vector<1x128xf32> to vector<128x128xf32>
    %6 = arith.addf %4, %5 : vector<128x128xf32>
    %cst_5 = arith.constant 0.000000e+00 : f32
    %7 = vector.broadcast %cst_5 : f32 to vector<128x128xf32>
    %8 = arith.maximumf %6, %7 : vector<128x128xf32>
    %c128 = arith.constant 128 : index
    %c0_6 = arith.constant 0 : index
    %9 = vector.load %arg2[%c128, %c0_6] : memref<896x256xbf16, #tpu.memory_space<vmem>>, vector<128x256xbf16>
    %c8 = arith.constant 8 : index
    %c0_7 = arith.constant 0 : index
    %10 = vector.load %arg4[%c8, %c0_7] : memref<72x256xf32, #tpu.memory_space<vmem>>, vector<1x256xf32>
    %11 = arith.truncf %8 : vector<128x128xf32> to vector<128x128xbf16>
    %cst_8 = arith.constant dense<0.000000e+00> : vector<128x256xf32>
    %12 = tpu.matmul %11, %9, %cst_8 {dimension_numbers = #tpu.dot_dimension_numbers<[1], [0], [0], [1], [0, 0, 1, 1], [], []>} : vector<128x128xbf16>, vector<128x256xbf16>, vector<128x256xf32> -> vector<128x256xf32>
    %13 = vector.broadcast %10 : vector<1x256xf32> to vector<128x256xf32>
    %14 = arith.addf %12, %13 : vector<128x256xf32>
    %cst_9 = arith.constant 0.000000e+00 : f32
    %15 = vector.broadcast %cst_9 : f32 to vector<128x256xf32>
    %16 = arith.maximumf %14, %15 : vector<128x256xf32>
    %c256 = arith.constant 256 : index
    %c0_10 = arith.constant 0 : index
    %17 = vector.load %arg2[%c256, %c0_10] : memref<896x256xbf16, #tpu.memory_space<vmem>>, vector<256x256xbf16>
    %c16 = arith.constant 16 : index
    %c0_11 = arith.constant 0 : index
    %18 = vector.load %arg4[%c16, %c0_11] : memref<72x256xf32, #tpu.memory_space<vmem>>, vector<1x256xf32>
    %19 = arith.truncf %16 : vector<128x256xf32> to vector<128x256xbf16>
    %cst_12 = arith.constant dense<0.000000e+00> : vector<128x256xf32>
    %20 = tpu.matmul %19, %17, %cst_12 {dimension_numbers = #tpu.dot_dimension_numbers<[1], [0], [0], [1], [0, 0, 1, 1], [], []>} : vector<128x256xbf16>, vector<256x256xbf16>, vector<128x256xf32> -> vector<128x256xf32>
    %21 = vector.broadcast %18 : vector<1x256xf32> to vector<128x256xf32>
    %22 = arith.addf %20, %21 : vector<128x256xf32>
    %cst_13 = arith.constant 0.000000e+00 : f32
    %23 = vector.broadcast %cst_13 : f32 to vector<128x256xf32>
    %24 = arith.maximumf %22, %23 : vector<128x256xf32>
    %c512 = arith.constant 512 : index
    %c0_14 = arith.constant 0 : index
    %25 = vector.load %arg2[%c512, %c0_14] : memref<896x256xbf16, #tpu.memory_space<vmem>>, vector<256x128xbf16>
    %c24 = arith.constant 24 : index
    %c0_15 = arith.constant 0 : index
    %26 = vector.load %arg4[%c24, %c0_15] : memref<72x256xf32, #tpu.memory_space<vmem>>, vector<1x128xf32>
    %27 = arith.truncf %24 : vector<128x256xf32> to vector<128x256xbf16>
    %cst_16 = arith.constant dense<0.000000e+00> : vector<128x128xf32>
    %28 = tpu.matmul %27, %25, %cst_16 {dimension_numbers = #tpu.dot_dimension_numbers<[1], [0], [0], [1], [0, 0, 1, 1], [], []>} : vector<128x256xbf16>, vector<256x128xbf16>, vector<128x128xf32> -> vector<128x128xf32>
    %29 = vector.broadcast %26 : vector<1x128xf32> to vector<128x128xf32>
    %30 = arith.addf %28, %29 : vector<128x128xf32>
    %cst_17 = arith.constant 0.000000e+00 : f32
    %31 = vector.broadcast %cst_17 : f32 to vector<128x128xf32>
    %32 = arith.maximumf %30, %31 : vector<128x128xf32>
    %c768 = arith.constant 768 : index
    %c0_18 = arith.constant 0 : index
    %33 = vector.load %arg2[%c768, %c0_18] : memref<896x256xbf16, #tpu.memory_space<vmem>>, vector<128x128xbf16>
    %c32 = arith.constant 32 : index
    %c0_19 = arith.constant 0 : index
    %34 = vector.load %arg4[%c32, %c0_19] : memref<72x256xf32, #tpu.memory_space<vmem>>, vector<1x128xf32>
    %35 = arith.truncf %32 : vector<128x128xf32> to vector<128x128xbf16>
    %cst_20 = arith.constant dense<0.000000e+00> : vector<128x128xf32>
    %36 = tpu.matmul %35, %33, %cst_20 {dimension_numbers = #tpu.dot_dimension_numbers<[1], [0], [0], [1], [0, 0, 1, 1], [], []>} : vector<128x128xbf16>, vector<128x128xbf16>, vector<128x128xf32> -> vector<128x128xf32>
    %37 = vector.broadcast %34 : vector<1x128xf32> to vector<128x128xf32>
    %38 = arith.addf %36, %37 : vector<128x128xf32>
    %c0_21 = arith.constant 0 : index
    %c0_22 = arith.constant 0 : index
    %39 = vector.load %arg3[%c0_21, %c0_22] : memref<512x128xbf16, #tpu.memory_space<vmem>>, vector<128x128xbf16>
    %c40 = arith.constant 40 : index
    %c0_23 = arith.constant 0 : index
    %40 = vector.load %arg4[%c40, %c0_23] : memref<72x256xf32, #tpu.memory_space<vmem>>, vector<1x128xf32>
    %41 = arith.truncf %0 : vector<128x128xf32> to vector<128x128xbf16>
    %cst_24 = arith.constant dense<0.000000e+00> : vector<128x128xf32>
    %42 = tpu.matmul %41, %39, %cst_24 {dimension_numbers = #tpu.dot_dimension_numbers<[1], [0], [0], [1], [0, 0, 1, 1], [], []>} : vector<128x128xbf16>, vector<128x128xbf16>, vector<128x128xf32> -> vector<128x128xf32>
    %43 = vector.broadcast %40 : vector<1x128xf32> to vector<128x128xf32>
    %44 = arith.addf %42, %43 : vector<128x128xf32>
    %cst_25 = arith.constant 0.000000e+00 : f32
    %45 = vector.broadcast %cst_25 : f32 to vector<128x128xf32>
    %46 = arith.maximumf %44, %45 : vector<128x128xf32>
    %c128_26 = arith.constant 128 : index
    %c0_27 = arith.constant 0 : index
    %47 = vector.load %arg3[%c128_26, %c0_27] : memref<512x128xbf16, #tpu.memory_space<vmem>>, vector<128x128xbf16>
    %c48 = arith.constant 48 : index
    %c0_28 = arith.constant 0 : index
    %48 = vector.load %arg4[%c48, %c0_28] : memref<72x256xf32, #tpu.memory_space<vmem>>, vector<1x128xf32>
    %49 = arith.truncf %46 : vector<128x128xf32> to vector<128x128xbf16>
    %cst_29 = arith.constant dense<0.000000e+00> : vector<128x128xf32>
    %50 = tpu.matmul %49, %47, %cst_29 {dimension_numbers = #tpu.dot_dimension_numbers<[1], [0], [0], [1], [0, 0, 1, 1], [], []>} : vector<128x128xbf16>, vector<128x128xbf16>, vector<128x128xf32> -> vector<128x128xf32>
    %51 = vector.broadcast %48 : vector<1x128xf32> to vector<128x128xf32>
    %52 = arith.addf %50, %51 : vector<128x128xf32>
    %cst_30 = arith.constant 0.000000e+00 : f32
    %53 = vector.broadcast %cst_30 : f32 to vector<128x128xf32>
    %54 = arith.maximumf %52, %53 : vector<128x128xf32>
    %c256_31 = arith.constant 256 : index
    %c0_32 = arith.constant 0 : index
    %55 = vector.load %arg3[%c256_31, %c0_32] : memref<512x128xbf16, #tpu.memory_space<vmem>>, vector<128x128xbf16>
    %c56 = arith.constant 56 : index
    %c0_33 = arith.constant 0 : index
    %56 = vector.load %arg4[%c56, %c0_33] : memref<72x256xf32, #tpu.memory_space<vmem>>, vector<1x128xf32>
    %57 = arith.truncf %54 : vector<128x128xf32> to vector<128x128xbf16>
    %cst_34 = arith.constant dense<0.000000e+00> : vector<128x128xf32>
    %58 = tpu.matmul %57, %55, %cst_34 {dimension_numbers = #tpu.dot_dimension_numbers<[1], [0], [0], [1], [0, 0, 1, 1], [], []>} : vector<128x128xbf16>, vector<128x128xbf16>, vector<128x128xf32> -> vector<128x128xf32>
    %59 = vector.broadcast %56 : vector<1x128xf32> to vector<128x128xf32>
    %60 = arith.addf %58, %59 : vector<128x128xf32>
    %cst_35 = arith.constant 0.000000e+00 : f32
    %61 = vector.broadcast %cst_35 : f32 to vector<128x128xf32>
    %62 = arith.maximumf %60, %61 : vector<128x128xf32>
    %c384 = arith.constant 384 : index
    %c0_36 = arith.constant 0 : index
    %63 = vector.load %arg3[%c384, %c0_36] : memref<512x128xbf16, #tpu.memory_space<vmem>>, vector<128x128xbf16>
    %c64 = arith.constant 64 : index
    %c0_37 = arith.constant 0 : index
    %64 = vector.load %arg4[%c64, %c0_37] : memref<72x256xf32, #tpu.memory_space<vmem>>, vector<1x128xf32>
    %65 = arith.truncf %62 : vector<128x128xf32> to vector<128x128xbf16>
    %cst_38 = arith.constant dense<0.000000e+00> : vector<128x128xf32>
    %66 = tpu.matmul %65, %63, %cst_38 {dimension_numbers = #tpu.dot_dimension_numbers<[1], [0], [0], [1], [0, 0, 1, 1], [], []>} : vector<128x128xbf16>, vector<128x128xbf16>, vector<128x128xf32> -> vector<128x128xf32>
    %67 = vector.broadcast %64 : vector<1x128xf32> to vector<128x128xf32>
    %68 = arith.addf %66, %67 : vector<128x128xf32>
    %69 = arith.addf %38, %68 : vector<128x128xf32>
    %cst_39 = arith.constant 1.000000e-01 : f32
    %70 = vector.broadcast %cst_39 : f32 to vector<128x128xf32>
    %71 = arith.mulf %70, %0 : vector<128x128xf32>
    %72 = arith.subf %69, %71 : vector<128x128xf32>
    %c0_40 = arith.constant 0 : index
    %c0_41 = arith.constant 0 : index
    %73 = vector.load %arg5[%c0_40, %c0_41] : memref<128x128xf32, #tpu.memory_space<vmem>>, vector<128x128xf32>
    tpu.vector_store %arg5[%c0_40, %c0_41], %72 {strides = array<i32>} : memref<128x128xf32, #tpu.memory_space<vmem>>, vector<128x128xf32>,
    return
  }
  func.func @transform_0(%arg0: i32) -> (i32, i32) {
    %c0_i32 = arith.constant 0 : i32
    %c0_i32_0 = arith.constant 0 : i32
    return %arg0, %c0_i32 : i32, i32
  }
  func.func @transform_1(%arg0: i32) -> (i32, i32) {
    %c0_i32 = arith.constant 0 : i32
    %c0_i32_0 = arith.constant 0 : i32
    %c0_i32_1 = arith.constant 0 : i32
    return %c0_i32, %c0_i32_0 : i32, i32
  }
  func.func @transform_2(%arg0: i32) -> (i32, i32) {
    %c0_i32 = arith.constant 0 : i32
    %c0_i32_0 = arith.constant 0 : i32
    %c0_i32_1 = arith.constant 0 : i32
    return %c0_i32, %c0_i32_0 : i32, i32
  }
  func.func @transform_3(%arg0: i32) -> (i32, i32) {
    %c0_i32 = arith.constant 0 : i32
    %c0_i32_0 = arith.constant 0 : i32
    %c0_i32_1 = arith.constant 0 : i32
    return %c0_i32, %c0_i32_0 : i32, i32
  }
  func.func @transform_4(%arg0: i32) -> (i32, i32) {
    %c0_i32 = arith.constant 0 : i32
    %c0_i32_0 = arith.constant 0 : i32
    return %arg0, %c0_i32 : i32, i32
  }
}

</mosaic_0001>

<bundles_post_ra>
// kernel: neg.4
= control target key start
LH: loop header
LB: loop body
LE: loop exit
PB: predicated region body
PF: predicated region fallthrough
CT: control target
= control target key end

     0   :  { %s72_s0 = inlined_call_operand.vmem [shape: f32[512,1], index: 0, kind: input, shape index: {}]   ;;  %s73_s1 = inlined_call_operand.vmem [shape: f32[512,1], index: 1, kind: output, shape index: {}]  }
   0x1   :  { %v2_v0 = vld [vmem:[%s72_s0] sm:$0x1]  ;;  %v32_v1 = vld [vmem:[%s72_s0 + $0x1] sm:$0x1]  ;;  %v34_v2 = vld [vmem:[%s72_s0 + $0x2] sm:$0x1] }
   0x2   :  { %v5_v3 = vxor.u32 2147483648, %v2_v0  ;;  %v12_v4 = vxor.u32 2147483648, %v32_v1  ;;  %v20_v5 = vxor.u32 2147483648, %v34_v2  ;;  %v36_v6 = vld [vmem:[%s72_s0 + $0x3] sm:$0x1] }
   0x3   :  { %v28_v7 = vxor.u32 2147483648, %v36_v6 }
   0x4   :  { %7 = vst [vmem:[%s73_s1] sm:$0x1] %v5_v3  ;;  %33 = vst [vmem:[%s73_s1 + $0x1] sm:$0x1] %v12_v4 }
   0x5   :  { %35 = vst [vmem:[%s73_s1 + $0x2] sm:$0x1] %v20_v5  ;;  %37 = vst [vmem:[%s73_s1 + $0x3] sm:$0x1] %v28_v7 }

// kernel: cos.0
= control target key start
LH: loop header
LB: loop body
LE: loop exit
PB: predicated region body
PF: predicated region fallthrough
CT: control target
= control target key end

     0   :  { %v488_v27 = vmov 683565275   ;;  %v489_v29 = vmov 2475754826   ;;  %v490_v31 = vmov 2131351028   ;;  %s800_s0 = inlined_call_operand.vmem [shape: f32[512,1], index: 0, kind: input, shape index: {}]   ;;  %s801_s1 = inlined_call_operand.vmem [shape: f32[512,1], index: 1, kind: output, shape index: {}]  }
   0x1   :  { %v507_v0 = vld [vmem:[%s800_s0] sm:$0x1]  ;;  %v514_v3 = vld [vmem:[%s800_s0 + $0x1] sm:$0x1]  ;;  %v519_v4 = vld [vmem:[%s800_s0 + $0x2] sm:$0x1] }
   0x2   :  { %v3_v1 = vand.u32 2147483647, %v507_v0  ;;  %v6_v2 = vand.u32 2139095040, %v507_v0  ;;  %v109_v7 = vand.u32 2147483647, %v514_v3  ;;  %v112_v8 = vand.u32 2139095040, %v514_v3 }
   0x3   :  { %v219_v10 = vand.u32 2139095040, %v519_v4  ;;  %v216_v22 = vand.u32 2147483647, %v519_v4  ;;  %v491_v33 = vmov 2102212464  }
   0x4   :  { %v7_v5 = vshrl.u32 %v6_v2, 23  ;;  %v10_v6 = vand.u32 8388607, %v3_v1  ;;  %v113_v11 = vshrl.u32 %v112_v8, 23  ;;  %v116_v12 = vand.u32 8388607, %v109_v7 }
   0x5   :  { %v220_v17 = vshrl.u32 %v219_v10, 23  ;;  %v492_v35 = vmov 920167782   ;;  %v493_v42 = vmov 1326507024  }
   0x6   :  { %v428_v9 = vadd.s32 4294967169, %v7_v5  ;;  %v11_v14 = vor.u32 8388608, %v10_v6  ;;  %v433_v15 = vadd.s32 4294967169, %v113_v11  ;;  %v117_v16 = vor.u32 8388608, %v116_v12 }
   0x7   :  { %v533_v25 = vadd.s32 4294967169, %v220_v17 }
   0x8   :  { %v13_v13 = vadd.s32 1, %v428_v9  ;;  %v119_v19 = vadd.s32 1, %v433_v15  ;;  %v529_v23 = vshll.u32 %v11_v14, 8  ;;  %v531_v24 = vshll.u32 %v117_v16, 8 }
   0x9   :  { %v226_v25 = vadd.s32 1, %v533_v25 }
   0xa   :  { %vm14_vm0 = vcmp.gt.s32.totalorder %v13_v13, 0  ;;  %vm120_vm1 = vcmp.gt.s32.totalorder %v119_v19, 0 }
   0xb   :  { %v15_v18 = vsel %vm14_vm0, %v13_v13, 0  ;;  %v121_v47 = vsel %vm120_vm1, %v119_v19, 0  ;;  %vm227_vm11 = vcmp.gt.s32.totalorder %v226_v25, 0 }
   0xc   :  { %v16_v20 = vshrl.u32 %v15_v18, 5  ;;  %v17_v21 = vand.u32 31, %v15_v18  ;;  %v122_v50 = vshrl.u32 %v121_v47, 5  ;;  %v123_v51 = vand.u32 31, %v121_v47 }
   0xe   :  { %v18_v26 = vsub.s32 32, %v17_v21  ;;  %v20_v28 = vshll.u32 %v488_v27, %v17_v21  ;;  %v23_v30 = vshll.u32 %v489_v29, %v17_v21  ;;  %v26_v32 = vshll.u32 %v490_v31, %v17_v21 }
   0xf   :  { %v29_v34 = vshll.u32 %v491_v33, %v17_v21  ;;  %v32_v36 = vshll.u32 %v492_v35, %v17_v21  ;;  %vm35_vm2 = vcmp.lt.s32.totalorder %v16_v20, 1  ;;  %vm36_vm3 = vcmp.lt.s32.totalorder %v16_v20, 2 }
  0x10   :  { %v19_v37 = vshrl.u32 %v488_v27, %v18_v26  ;;  %v21_v38 = vshrl.u32 %v489_v29, %v18_v26  ;;  %v24_v39 = vshrl.u32 %v490_v31, %v18_v26  ;;  %v27_v40 = vshrl.u32 %v491_v33, %v18_v26 }
  0x11   :  { %v30_v41 = vshrl.u32 %v492_v35, %v18_v26  ;;  %v33_v43 = vshrl.u32 %v493_v42, %v18_v26  ;;  %vm37_vm4 = vcmp.lt.s32.totalorder %v16_v20, 3  ;;  %vm38_vm5 = vcmp.lt.s32.totalorder %v16_v20, 4 }
  0x12   :  { %v22_v44 = vor.u32 %v21_v38, %v20_v28  ;;  %v25_v45 = vor.u32 %v24_v39, %v23_v30  ;;  %v28_v46 = vor.u32 %v27_v40, %v26_v32  ;;  %v124_v59 = vsub.s32 32, %v123_v51 }
  0x13   :  { %v31_v48 = vor.u32 %v30_v41, %v29_v34  ;;  %v34_v49 = vor.u32 %v33_v43, %v32_v36  ;;  %v126_v63 = vshll.u32 %v488_v27, %v123_v51  ;;  %v129_v14 = vshll.u32 %v489_v29, %v123_v51 }
  0x14   :  { %v39_v52 = vsel %vm35_vm2, %v19_v37, %v22_v44  ;;  %v40_v53 = vsel %vm38_vm5, %v28_v46, 2102212464  ;;  %v43_v54 = vsel %vm35_vm2, %v22_v44, %v25_v45  ;;  %v47_v55 = vsel %vm35_vm2, %v25_v45, %v28_v46 }
  0x15   :  { %v41_v56 = vsel %vm37_vm4, %v25_v45, %v40_v53  ;;  %v44_v57 = vsel %vm38_vm5, %v31_v48, 920167782  ;;  %v48_v58 = vsel %vm38_vm5, %v34_v49, 1326507024  ;;  %v125_v8 = vshrl.u32 %v488_v27, %v124_v59 }
  0x16   :  { %v42_v60 = vsel %vm36_vm3, %v39_v52, %v41_v56  ;;  %v45_v61 = vsel %vm37_vm4, %v28_v46, %v44_v57  ;;  %v49_v62 = vsel %vm37_vm4, %v31_v48, %v48_v58  ;;  %v127_v13 = vshrl.u32 %v489_v29, %v124_v59 }
  0x17   :  { %v46_v2 = vsel %vm36_vm3, %v43_v54, %v45_v61  ;;  %v50_v5 = vsel %vm36_vm3, %v47_v55, %v49_v62  ;;  %v58_v6 = vmul.u32 %v529_v23, %v42_v60  ;;  %v130_v15 = vshrl.u32 %v490_v31, %v124_v59  ;;  %v604_v60 = vld [vmem:[%s800_s0 + $0x3] sm:$0x1] }
  0x18   :  { %v560_v9 = vmul.u32.u64.low %v529_v23, %v50_v5  ;;  %v561_v10 = vmul.u32.u64.high %v529_v23, %v50_v5, %v560_v9  ;;  %v564_v11 = vmul.u32.u64.low %v529_v23, %v46_v2  ;;  %v565_v12 = vmul.u32.u64.high %v529_v23, %v46_v2, %v564_v11 }
  0x19   :  { %v132_v16 = vshll.u32 %v490_v31, %v123_v51  ;;  %v133_v17 = vshrl.u32 %v491_v33, %v124_v59  ;;  %v135_v18 = vshll.u32 %v491_v33, %v123_v51  ;;  %v136_v19 = vshrl.u32 %v492_v35, %v124_v59 }
  0x1a   :  { %v138_v20 = vshll.u32 %v492_v35, %v123_v51  ;;  %v128_v21 = vor.u32 %v127_v13, %v126_v63  ;;  %v131_v23 = vor.u32 %v130_v15, %v129_v14  ;;  %v139_v26 = vshrl.u32 %v493_v42, %v124_v59 }
  0x1b   :  { %vm141_vm6 = vcmp.lt.s32.totalorder %v122_v50, 1  ;;  %vm60_vm7 = vc.u32 %v561_v10, %v564_v11  ;;  %v61_v28 = vadd.s32 1, %v565_v12  ;;  %v134_v30 = vor.u32 %v133_v17, %v132_v16 }
  0x1c   :  { %v137_v32 = vor.u32 %v136_v19, %v135_v18  ;;  %v140_v34 = vor.u32 %v139_v26, %v138_v20  ;;  %vm142_vm8 = vcmp.lt.s32.totalorder %v122_v50, 2  ;;  %vm143_vm9 = vcmp.lt.s32.totalorder %v122_v50, 3 }
  0x1d   :  { %v62_v36 = vsel %vm60_vm7, %v61_v28, %v565_v12  ;;  %vm144_vm10 = vcmp.lt.s32.totalorder %v122_v50, 4  ;;  %v145_v37 = vsel %vm141_vm6, %v125_v8, %v128_v21  ;;  %v149_v38 = vsel %vm141_vm6, %v128_v21, %v131_v23 }
  0x1e   :  { %v63_v39 = vadd.s32 %v62_v36, %v58_v6  ;;  %v146_v40 = vsel %vm144_vm10, %v134_v30, 2102212464  ;;  %v150_v41 = vsel %vm144_vm10, %v137_v32, 920167782  ;;  %v153_v43 = vsel %vm141_vm6, %v131_v23, %v134_v30 }
  0x1f   :  { %v147_v44 = vsel %vm143_vm9, %v131_v23, %v146_v40  ;;  %v151_v45 = vsel %vm143_vm9, %v134_v30, %v150_v41  ;;  %v154_v46 = vsel %vm144_vm10, %v140_v34, 1326507024  ;;  %v223_v51 = vand.u32 8388607, %v216_v22 }
  0x20   :  { %v64_v47 = vadd.s32 536870912, %v63_v39  ;;  %v152_v48 = vsel %vm142_vm8, %v149_v38, %v151_v45  ;;  %v155_v49 = vsel %vm143_vm9, %v137_v32, %v154_v46  ;;  %v148_v52 = vsel %vm142_vm8, %v145_v37, %v147_v44 }
  0x21   :  { %v156_v50 = vsel %vm142_vm8, %v153_v43, %v155_v49  ;;  %v591_v53 = vmul.u32.u64.low %v531_v24, %v152_v48  ;;  %v592_v54 = vmul.u32.u64.high %v531_v24, %v152_v48, %v591_v53  ;;  %v228_v58 = vsel %vm227_vm11, %v226_v25, 0 }
  0x22   :  { %v595_v55 = vshrl.u32 %v64_v47, 30  ;;  %v598_v56 = vmul.u32.u64.low %v531_v24, %v156_v50  ;;  %v599_v57 = vmul.u32.u64.high %v531_v24, %v156_v50, %v598_v56  ;;  %v230_v59 = vand.u32 31, %v228_v58 }
  0x23   :  { %v164_v24 = vmul.u32 %v531_v24, %v148_v52  ;;  %v167_v62 = vadd.s32 1, %v592_v54  ;;  %v224_v5 = vor.u32 8388608, %v223_v51  ;;  %v326_v6 = vand.u32 2139095040, %v604_v60 }
  0x24   :  { %v66_v61 = vshll.u32 %v595_v55, 30  ;;  %v231_v63 = vsub.s32 32, %v230_v59  ;;  %vm166_vm12 = vc.u32 %v599_v57, %v591_v53  ;;  %v233_v9 = vshll.u32 %v488_v27, %v230_v59 }
  0x25   :  { %v168_v8 = vsel %vm166_vm12, %v167_v62, %v592_v54  ;;  %v236_v15 = vshll.u32 %v489_v29, %v230_v59  ;;  %v239_v17 = vshll.u32 %v490_v31, %v230_v59  ;;  %v242_v19 = vshll.u32 %v491_v33, %v230_v59 }
  0x26   :  { %v609_v2 = vsub.s32 %v63_v39, %v66_v61  ;;  %v169_v13 = vadd.s32 %v168_v8, %v164_v24  ;;  %v234_v14 = vshrl.u32 %v489_v29, %v231_v63  ;;  %v237_v16 = vshrl.u32 %v490_v31, %v231_v63 }
  0x27   :  { %v240_v18 = vshrl.u32 %v491_v33, %v231_v63  ;;  %v229_v21 = vshrl.u32 %v228_v58, 5  ;;  %v624_v23 = vshll.u32 %v224_v5, 8  ;;  %v327_v26 = vshrl.u32 %v326_v6, 23 }
  0x28   :  { %v69_v12 = vsub.s32 0, %v609_v2  ;;  %v59_v10 = vadd.s32 %v564_v11, %v561_v10  ;;  %v170_v11 = vadd.s32 536870912, %v169_v13  ;;  %v232_v28 = vshrl.u32 %v488_v27, %v231_v63 }
  0x29   :  { %v243_v30 = vshrl.u32 %v492_v35, %v231_v63  ;;  %v235_v32 = vor.u32 %v234_v14, %v233_v9  ;;  %v245_v34 = vshll.u32 %v492_v35, %v230_v59  ;;  %v246_v36 = vshrl.u32 %v493_v42, %v231_v63 }
  0x2a   :  { %v429_v20 = vmin.u32 %v69_v12, %v609_v2  ;;  %v632_v37 = vshrl.u32 %v170_v11, 30  ;;  %v238_v38 = vor.u32 %v237_v16, %v236_v15  ;;  %v241_v39 = vor.u32 %v240_v18, %v239_v17 }
  0x2b   :  { %v244_v40 = vor.u32 %v243_v30, %v242_v19  ;;  %vm248_vm13 = vcmp.lt.s32.totalorder %v229_v21, 1  ;;  %vm251_vm14 = vcmp.lt.s32.totalorder %v229_v21, 4  ;;  %v445_v43 = vadd.s32 4294967169, %v327_v26 }
  0x2c   :  { %v71_v25 = vclz %v429_v20  ;;  %v89_v44 = vsub.s32 4, %v595_v55  ;;  %v172_v45 = vshll.u32 %v632_v37, 30  ;;  %v247_v46 = vor.u32 %v246_v36, %v245_v34 }
  0x2d   :  { %v253_v47 = vsel %vm251_vm14, %v241_v39, 2102212464  ;;  %vm249_vm0 = vcmp.lt.s32.totalorder %v229_v21, 2  ;;  %vm250_vm1 = vcmp.lt.s32.totalorder %v229_v21, 3  ;;  %v257_v48 = vsel %vm251_vm14, %v244_v40, 920167782 }
  0x2e   :  { %v430_v41 = vadd.s32 4294967294, %v71_v25  ;;  %v638_v51 = vsub.s32 %v169_v13, %v172_v45  ;;  %v252_v52 = vsel %vm248_vm13, %v232_v28, %v235_v32  ;;  %v256_v50 = vsel %vm248_vm13, %v235_v32, %v238_v38 }
  0x2f   :  { %v254_v59 = vsel %vm250_vm1, %v238_v38, %v253_v47  ;;  %v258_v24 = vsel %vm250_vm1, %v241_v39, %v257_v48  ;;  %v260_v62 = vsel %vm248_vm13, %v238_v38, %v241_v39  ;;  %v261_v63 = vsel %vm251_vm14, %v247_v46, 1326507024 }
  0x30   :  { %vm431_vm15 = vcmp.lt.s32.totalorder %v430_v41, 0  ;;  %v175_v61 = vsub.s32 0, %v638_v51  ;;  %vm5_vm2 = vcmp.lt.s32.totalorder %v507_v0, 0  ;;  %v262_v6 = vsel %vm250_vm1, %v244_v40, %v261_v63 }
  0x31   :  { %v74_v49 = vsel %vm431_vm15, 0, %v430_v41  ;;  %v90_v55 = vsel %vm5_vm2, %v89_v44, %v595_v55  ;;  %v259_v9 = vsel %vm249_vm0, %v256_v50, %v258_v24  ;;  %v323_v12 = vand.u32 2147483647, %v604_v60 }
  0x32   :  { %v75_v54 = vsub.s32 32, %v74_v49  ;;  %v76_v56 = vshll.u32 %v609_v2, %v74_v49  ;;  %v79_v58 = vsub.s32 4294967266, %v74_v49  ;;  %v434_v8 = vmin.u32 %v175_v61, %v638_v51 }
  0x33   :  { %v255_v15 = vsel %vm249_vm0, %v252_v52, %v254_v59  ;;  %v263_v16 = vsel %vm249_vm0, %v260_v62, %v262_v6  ;;  %v333_v20 = vadd.s32 1, %v445_v43  ;;  %v669_v30 = vand.u32 8388607, %v323_v12 }
  0x34   :  { %v77_v2 = vshrl.u32 %v59_v10, %v75_v54  ;;  %v80_v5 = vadd.s32 127, %v79_v58  ;;  %v177_v17 = vclz %v434_v8  ;;  %vm673_vm4 = vcmp.le.f32.partialorder %v3_v1, 0.7853982 }
  0x35   :  { %v659_v18 = vmul.u32.u64.low %v624_v23, %v263_v16  ;;  %v660_v19 = vmul.u32.u64.high %v624_v23, %v263_v16, %v659_v18  ;;  %v663_v10 = vmul.u32.u64.low %v624_v23, %v259_v9  ;;  %v664_v11 = vmul.u32.u64.high %v624_v23, %v259_v9, %v663_v10 }
  0x36   :  { %v78_v13 = vor.u32 %v77_v2, %v76_v56  ;;  %v81_v14 = vshll.u32 %v80_v5, 23  ;;  %v435_v28 = vadd.s32 4294967294, %v177_v17  ;;  %vm334_vm3 = vcmp.gt.s32.totalorder %v333_v20, 0 }
  0x37   :  { %v165_v53 = vadd.s32 %v591_v53, %v599_v57  ;;  %v335_v57 = vsel %vm334_vm3, %v333_v20, 0  ;;  %v92_v32 = vsel %vm673_vm4, 0, %v90_v55  ;;  %v271_v23 = vmul.u32 %v624_v23, %v255_v15 }
  0x38   :  { %v82_v21 = vor.u32 4788187, %v81_v14  ;;  %v85_v26 = vcvt.s32.f32 %v78_v13  ;;  %vm436_vm5 = vcmp.lt.s32.totalorder %v435_v28, 0  ;;  %vm273_vm6 = vc.u32 %v660_v19, %v663_v10 }
  0x39   :  { %v180_v36 = vsel %vm436_vm5, 0, %v435_v28  ;;  %v274_v38 = vadd.s32 1, %v664_v11  ;;  %v337_v39 = vand.u32 31, %v335_v57  ;;  %vm111_vm7 = vcmp.lt.s32.totalorder %v514_v3, 0 }
  0x3a   :  { %v83_v25 = vand.u32 2147483647, %v82_v21  ;;  %v181_v40 = vsub.s32 32, %v180_v36  ;;  %v182_v41 = vshll.u32 %v638_v51, %v180_v36  ;;  %v185_v43 = vsub.s32 4294967266, %v180_v36 }
  0x3b   :  { %v331_v44 = vor.u32 8388608, %v669_v30  ;;  %v688_v46 = vand.u32 3, %v92_v32  ;;  %v275_v47 = vsel %vm273_vm6, %v274_v38, %v664_v11  ;;  %v338_v48 = vsub.s32 32, %v337_v39 }
  0x3c   :  { %v86_v34 = vmul.f32 %v85_v26, %v83_v25  ;;  %v183_v49 = vshrl.u32 %v165_v53, %v181_v40  ;;  %v186_v51 = vadd.s32 127, %v185_v43  ;;  %v195_v52 = vsub.s32 4, %v632_v37 }
  0x3d   :  { %v276_v50 = vadd.s32 %v275_v47, %v271_v23  ;;  %vm696_vm8 = vcmp.le.f32.partialorder %v109_v7, 0.7853982  ;;  %v700_v56 = vshrl.u32 %v335_v57, 5  ;;  %v340_v58 = vshll.u32 %v488_v27, %v337_v39 }
  0x3e   :  { %v87_v45 = vxor.u32 2147483648, %v86_v34  ;;  %v343_v59 = vshll.u32 %v489_v29, %v337_v39  ;;  %v184_v24 = vor.u32 %v183_v49, %v182_v41  ;;  %v187_v62 = vshll.u32 %v186_v51, 23 }
  0x3f   :  { %v277_v63 = vadd.s32 536870912, %v276_v50  ;;  %v341_v29 = vshrl.u32 %v489_v29, %v338_v48  ;;  %v344_v2 = vshrl.u32 %v490_v31, %v338_v48  ;;  %v346_v31 = vshll.u32 %v490_v31, %v337_v39 }
  0x40   :  { %v88_v54 = vsel %vm5_vm2, %v87_v45, %v86_v34  ;;  %v188_v5 = vor.u32 4788187, %v187_v62  ;;  %v191_v6 = vcvt.s32.f32 %v184_v24  ;;  %v347_v8 = vshrl.u32 %v491_v33, %v338_v48 }
  0x41   :  { %v91_v61 = vsel %vm673_vm4, %v507_v0, %v88_v54  ;;  %v710_v55 = vshrl.u32 %v277_v63, 30  ;;  %v349_v33 = vshll.u32 %v491_v33, %v337_v39  ;;  %v350_v9 = vshrl.u32 %v492_v35, %v338_v48 }
  0x42   :  { %472 = vcosq.f32 %v91_v61  ;;  %v352_v35 = vshll.u32 %v492_v35, %v337_v39  ;;  %vm98_vm9 = vcmp.eq.s32.totalorder %v688_v46, 0  ;;  %v189_v13 = vand.u32 2147483647, %v188_v5 }
  0x43   :  { %474 = vsinq.f32 %v91_v61  ;;  %v279_v14 = vshll.u32 %v710_v55, 30  ;;  %v353_v42 = vshrl.u32 %v493_v42, %v338_v48  ;;  %vm97_vm10 = vcmp.lt.s32.totalorder %v688_v46, 2 }
  0x44   :  { %vm101_vm11 = vcmp.eq.s32.totalorder %v688_v46, 2  ;;  %v196_v37 = vsel %vm111_vm7, %v195_v52, %v632_v37  ;;  %v342_v15 = vor.u32 %v341_v29, %v340_v58  ;;  %v351_v16 = vor.u32 %v350_v9, %v349_v33 }
  0x45   :  { %vm95_vm12 = vweird.f32 %v507_v0  ;;  %v192_v17 = vmul.f32 %v191_v6, %v189_v13  ;;  %v280_v18 = vsub.s32 %v276_v50, %v279_v14  ;;  %v345_v20 = vor.u32 %v344_v2, %v343_v59 }
  0x46   :  { %v354_v21 = vor.u32 %v353_v42, %v352_v35  ;;  %v339_v27 = vshrl.u32 %v488_v27, %v338_v48  ;;  %v348_v26 = vor.u32 %v347_v8, %v346_v31  ;;  %vm355_vm13 = vcmp.lt.s32.totalorder %v700_v56, 1 }
  0x47   :  { %vm358_vm14 = vcmp.lt.s32.totalorder %v700_v56, 4  ;;  %v193_v11 = vxor.u32 2147483648, %v192_v17  ;;  %v198_v28 = vsel %vm696_vm8, 0, %v196_v37  ;;  %v282_v30 = vsub.s32 0, %v280_v18 }
  0x48   :  { %vm357_vm15 = vcmp.lt.s32.totalorder %v700_v56, 3  ;;  %vm356_vm0 = vcmp.lt.s32.totalorder %v700_v56, 2  ;;  %v360_v1 = vsel %vm358_vm14, %v348_v26, 2102212464  ;;  %v364_v25 = vsel %vm358_vm14, %v351_v16, 920167782 }
  0x49   :  { %v371_v53 = vshll.u32 %v331_v44, 8  ;;  %v194_v57 = vsel %vm111_vm7, %v193_v11, %v192_v17  ;;  %v440_v32 = vmin.u32 %v282_v30, %v280_v18  ;;  %v363_v23 = vsel %vm355_vm13, %v342_v15, %v345_v20 }
  0x4a   :  { %v368_v34 = vsel %vm358_vm14, %v354_v21, 1326507024  ;;  %v197_v38 = vsel %vm696_vm8, %v514_v3, %v194_v57  ;;  %v359_v39 = vsel %vm355_vm13, %v339_v27, %v342_v15  ;;  %v365_v40 = vsel %vm357_vm15, %v348_v26, %v364_v25 }
  0x4b   :  { %v367_v41 = vsel %vm355_vm13, %v345_v20, %v348_v26  ;;  %476 = vcosq.f32 %v197_v38  ;;  %v284_v45 = vclz %v440_v32  ;;  %v361_v47 = vsel %vm357_vm15, %v345_v20, %v360_v1 }
  0x4c   :  { %v473_v36 = vpop.eup %472  ;;  %478 = vsinq.f32 %v197_v38  ;;  %v366_v49 = vsel %vm356_vm0, %v363_v23, %v365_v40  ;;  %v369_v51 = vsel %vm357_vm15, %v351_v16, %v368_v34  ;;  %v272_v19 = vadd.s32 %v663_v10, %v660_v19 }
  0x4d   :  { %v475_v43 = vpop.eup %474  ;;  %v102_v44 = vxor.u32 2147483648, %v473_v36  ;;  %v441_v10 = vadd.s32 4294967294, %v284_v45  ;;  %v370_v50 = vsel %vm356_vm0, %v367_v41, %v369_v51  ;;  %v362_v7 = vsel %vm356_vm0, %v359_v39, %v361_v47 }
  0x4e   :  { %v99_v48 = vxor.u32 2147483648, %v475_v43  ;;  %v761_v56 = vmul.u32.u64.low %v371_v53, %v370_v50  ;;  %v762_v58 = vmul.u32.u64.high %v371_v53, %v370_v50, %v761_v56  ;;  %v202_v62 = vand.u32 3, %v198_v28 }
  0x4f   :  { %v103_v52 = vsel %vm101_vm11, %v102_v44, %v475_v43  ;;  %vm442_vm1 = vcmp.lt.s32.totalorder %v441_v10, 0  ;;  %v766_v59 = vmul.u32.u64.low %v371_v53, %v366_v49  ;;  %v767_v61 = vmul.u32.u64.high %v371_v53, %v366_v49, %v766_v59 }
  0x50   :  { %v100_v54 = vsel %vm98_vm9, %v473_v36, %v99_v48  ;;  %v287_v24 = vsel %vm442_vm1, 0, %v441_v10  ;;  %v378_v31 = vmul.u32 %v371_v53, %v362_v7  ;;  %vm207_vm3 = vcmp.eq.s32.totalorder %v202_v62, 2 }
  0x51   :  { %v104_v46 = vsel %vm97_vm10, %v100_v54, %v103_v52  ;;  %v288_v63 = vsub.s32 32, %v287_v24  ;;  %v289_v29 = vshll.u32 %v280_v18, %v287_v24  ;;  %v292_v2 = vsub.s32 4294967266, %v287_v24 }
  0x52   :  { %v105_v0 = vsel %vm95_vm12, nan, %v104_v46  ;;  %vm380_vm2 = vc.u32 %v762_v58, %v766_v59  ;;  %v381_v8 = vadd.s32 1, %v767_v61  ;;  %vm204_vm4 = vcmp.eq.s32.totalorder %v202_v62, 0 }
  0x53   :  { %106 = vst [vmem:[%s801_s1] sm:$0x1] %v105_v0  ;;  %v290_v5 = vshrl.u32 %v272_v19, %v288_v63  ;;  %v293_v6 = vadd.s32 127, %v292_v2  ;;  %vm203_vm5 = vcmp.lt.s32.totalorder %v202_v62, 2  ;;  %vm201_vm6 = vweird.f32 %v514_v3 }
  0x54   :  { %v382_v13 = vsel %vm380_vm2, %v381_v8, %v767_v61  ;;  %vm218_vm7 = vcmp.lt.s32.totalorder %v519_v4, 0  ;;  %vm217_vm8 = vcmp.le.f32.partialorder %v216_v22, 0.7853982  ;;  %v302_v1 = vsub.s32 4, %v710_v55 }
  0x55   :  { %v477_v33 = vpop.eup %476  ;;  %v291_v9 = vor.u32 %v290_v5, %v289_v29  ;;  %v294_v35 = vshll.u32 %v293_v6, 23  ;;  %v383_v37 = vadd.s32 %v382_v13, %v378_v31  ;;  %v379_v40 = vadd.s32 %v766_v59, %v762_v58 }
  0x56   :  { %v479_v14 = vpop.eup %478  ;;  %v208_v42 = vxor.u32 2147483648, %v477_v33  ;;  %v303_v55 = vsel %vm218_vm7, %v302_v1, %v710_v55  ;;  %vm308_vm13 = vweird.f32 %v519_v4  ;;  %vm325_vm14 = vcmp.lt.s32.totalorder %v604_v60, 0 }
  0x57   :  { %v205_v15 = vxor.u32 2147483648, %v479_v14  ;;  %v295_v16 = vor.u32 4788187, %v294_v35  ;;  %v298_v17 = vcvt.s32.f32 %v291_v9  ;;  %v384_v18 = vadd.s32 536870912, %v383_v37 }
  0x58   :  { %v209_v3 = vsel %vm207_vm3, %v208_v42, %v479_v14  ;;  %v305_v34 = vsel %vm217_vm8, 0, %v303_v55  ;;  %vm324_vm15 = vcmp.le.f32.partialorder %v323_v12, 0.7853982  ;;  %vm415_vm3 = vweird.f32 %v604_v60 }
  0x59   :  { %v206_v20 = vsel %vm204_vm4, %v477_v33, %v205_v15  ;;  %v296_v21 = vand.u32 2147483647, %v295_v16  ;;  %v385_v26 = vshrl.u32 %v384_v18, 30  ;;  %v309_v39 = vand.u32 3, %v305_v34 }
  0x5a   :  { %v210_v27 = vsel %vm203_vm5, %v206_v20, %v209_v3 }
  0x5b   :  { %v211_v11 = vsel %vm201_vm6, nan, %v210_v27  ;;  %v299_v28 = vmul.f32 %v298_v17, %v296_v21  ;;  %v386_v30 = vshll.u32 %v385_v26, 30  ;;  %vm314_vm10 = vcmp.eq.s32.totalorder %v309_v39, 2 }
  0x5c   :  { %437 = vst [vmem:[%s801_s1 + $0x1] sm:$0x1] %v211_v11  ;;  %vm311_vm11 = vcmp.eq.s32.totalorder %v309_v39, 0  ;;  %vm310_vm12 = vcmp.lt.s32.totalorder %v309_v39, 2  ;;  %v409_v0 = vsub.s32 4, %v385_v26 }
  0x5d   :  { %v300_v22 = vxor.u32 2147483648, %v299_v28  ;;  %v387_v25 = vsub.s32 %v383_v37, %v386_v30 }
  0x5e   :  { %v410_v63 = vsel %vm325_vm14, %v409_v0, %v385_v26 }
  0x5f   :  { %v301_v53 = vsel %vm218_vm7, %v300_v22, %v299_v28  ;;  %v389_v32 = vsub.s32 0, %v387_v25  ;;  %v412_v29 = vsel %vm324_vm15, 0, %v410_v63 }
  0x60   :  { %v304_v57 = vsel %vm217_vm8, %v519_v4, %v301_v53  ;;  %v416_v2 = vand.u32 3, %v412_v29 }
  0x61   :  { %480 = vcosq.f32 %v304_v57  ;;  %v446_v23 = vmin.u32 %v389_v32, %v387_v25 }
  0x62   :  { %482 = vsinq.f32 %v304_v57  ;;  %vm421_vm0 = vcmp.eq.s32.totalorder %v416_v2, 2  ;;  %vm418_vm1 = vcmp.eq.s32.totalorder %v416_v2, 0  ;;  %vm417_vm2 = vcmp.lt.s32.totalorder %v416_v2, 2 }
  0x63   :  { %v391_v36 = vclz %v446_v23 }
  0x65   :  { %v447_v38 = vadd.s32 4294967294, %v391_v36 }
  0x67   :  { %vm448_vm9 = vcmp.lt.s32.totalorder %v447_v38, 0 }
  0x68   :  { %v394_v41 = vsel %vm448_vm9, 0, %v447_v38 }
  0x69   :  { %v395_v43 = vsub.s32 32, %v394_v41  ;;  %v396_v44 = vshll.u32 %v387_v25, %v394_v41  ;;  %v399_v45 = vsub.s32 4294967266, %v394_v41 }
  0x6b   :  { %v481_v47 = vpop.eup %480  ;;  %v397_v51 = vshrl.u32 %v379_v40, %v395_v43  ;;  %v400_v52 = vadd.s32 127, %v399_v45 }
  0x6c   :  { %v483_v48 = vpop.eup %482  ;;  %v315_v49 = vxor.u32 2147483648, %v481_v47 }
  0x6d   :  { %v312_v19 = vxor.u32 2147483648, %v483_v48  ;;  %v398_v10 = vor.u32 %v397_v51, %v396_v44  ;;  %v401_v50 = vshll.u32 %v400_v52, 23 }
  0x6e   :  { %v316_v4 = vsel %vm314_vm10, %v315_v49, %v483_v48 }
  0x6f   :  { %v313_v54 = vsel %vm311_vm11, %v481_v47, %v312_v19  ;;  %v402_v56 = vor.u32 4788187, %v401_v50  ;;  %v405_v58 = vcvt.s32.f32 %v398_v10 }
  0x70   :  { %v317_v7 = vsel %vm310_vm12, %v313_v54, %v316_v4 }
  0x71   :  { %v318_v46 = vsel %vm308_vm13, nan, %v317_v7  ;;  %v403_v59 = vand.u32 2147483647, %v402_v56 }
  0x72   :  { %443 = vst [vmem:[%s801_s1 + $0x2] sm:$0x1] %v318_v46 }
  0x73   :  { %v406_v61 = vmul.f32 %v405_v58, %v403_v59 }
  0x75   :  { %v407_v12 = vxor.u32 2147483648, %v406_v61 }
  0x77   :  { %v408_v24 = vsel %vm325_vm14, %v407_v12, %v406_v61 }
  0x78   :  { %v411_v62 = vsel %vm324_vm15, %v604_v60, %v408_v24 }
  0x79   :  { %484 = vcosq.f32 %v411_v62 }
  0x7a   :  { %486 = vsinq.f32 %v411_v62 }
  0x83   :  { %v485_v31 = vpop.eup %484 }
  0x84   :  { %v487_v5 = vpop.eup %486  ;;  %v422_v6 = vxor.u32 2147483648, %v485_v31 }
  0x85   :  { %v419_v8 = vxor.u32 2147483648, %v487_v5 }
  0x86   :  { %v423_v60 = vsel %vm421_vm0, %v422_v6, %v487_v5 }
  0x87   :  { %v420_v33 = vsel %vm418_vm1, %v485_v31, %v419_v8 }
  0x88   :  { %v424_v9 = vsel %vm417_vm2, %v420_v33, %v423_v60 }
  0x89   :  { %v425_v35 = vsel %vm415_vm3, nan, %v424_v9 }
  0x8a   :  { %449 = vst [vmem:[%s801_s1 + $0x3] sm:$0x1] %v425_v35 }

// kernel: ode3_rhs_batched.1
= control target key start
LH: loop header
LB: loop body
LE: loop exit
PB: predicated region body
PF: predicated region fallthrough
CT: control target
= control target key end

     0   :  { %s3036_s15 = smov 0   ;;  %s3709_s0 = inlined_call_operand.vmem [shape: f32[512,128], index: 0, kind: input, shape index: {}]   ;;  %s3710_s1 = inlined_call_operand.vmem [shape: bf16[896,256], index: 1, kind: input, shape index: {}]   ;;  %s3711_s2 = inlined_call_operand.vmem [shape: bf16[512,128], index: 2, kind: input, shape index: {}]   ;;  %s3712_s3 = inlined_call_operand.vmem [shape: f32[72,256], index: 3, kind: input, shape index: {}]   ;;  %s3713_s4 = inlined_call_operand.vmem [shape: f32[512,128], index: 4, kind: output, shape index: {}]  }
   0x1 LB: > { %s2300_s16 = sadd.s32 4294967295, %s3008_s15   ;;  %p2304_p0 = scmp.ge.s32.totalorder %s3008_s15, 1  ;;  %s3008_s15 = sphi %s3036_s15, %s14_s15  }
   0x2   : > { %p163_p1 = scmp.lt.s32.totalorder %s3008_s15, 5 }
   0x4   : > { %p164_p2 = pnand %p2304_p0, %p163_p1 }
   0x5   : > { %v2850_v0 = vld [vmem:[%s3710_s1] ss:$8 sps:$4 sm:$0xff] (!%p164_p2)   ;;  %v2851_v1 = vld [vmem:[%s3710_s1 + $0x10] ss:$8 sps:$4 sm:$0xff] (!%p164_p2)   ;;  %s2305_s25 = sshll.u32 (!%p164_p2), %s2300_s16, 4  ;;  %v3010_v48 = vmov (!%p164_p2), 0  }
   0x6   : > { %167 = sbr.rel (%p164_p2) target bundleno = 1678 (0x68e), region = 36  ;;  %2585 = vmatprep.subr.bf16.mxu0 (!%p164_p2), %v2850_v0  ;;  %v2852_v2 = vld [vmem:[%s3710_s1 + $0x20] ss:$8 sps:$4 sm:$0xff] (!%p164_p2)   ;;  %v2853_v3 = vld [vmem:[%s3710_s1 + $0x30] ss:$8 sps:$4 sm:$0xff] (!%p164_p2)   ;;  %p190_p3 = scmp.lt.s32.totalorder (!%p164_p2), %s2305_s25, 63  ;;  %553 = vmatprep.mubr.bf16.mxu1 (!%p164_p2), %v3010_v48 }
   0x7   : > { %2586 = vmatpush3.bf16.msra.mxu0 (!%p164_p2), %v2850_v0  ;;  %v2858_v4 = vld [vmem:[%s3710_s1 + $0x84] ss:$8 sps:$4 sm:$0xff] (!%p164_p2)   ;;  %v2860_v5 = vld [vmem:[%s3710_s1 + $0x80] ss:$8 sps:$4 sm:$0xff] (!%p164_p2)   ;;  %v2861_v6 = vld [vmem:[%s3710_s1 + $0x94] ss:$8 sps:$4 sm:$0xff] (!%p164_p2)  }
   0x8   : > { %2587 = vmatprep.subr.bf16.mxu0 (!%p164_p2), %v2851_v1  ;;  %521 = vmatprep.subr.bf16.mxu1 (!%p164_p2), %v2858_v4  ;;  %v2854_v7 = vld [vmem:[%s3710_s1 + $0x40] ss:$8 sps:$4 sm:$0xff] (!%p164_p2)   ;;  %v2863_v8 = vld [vmem:[%s3710_s1 + $0x90] ss:$8 sps:$4 sm:$0xff] (!%p164_p2)   ;;  %v2864_v9 = vld [vmem:[%s3710_s1 + $0xa4] ss:$8 sps:$4 sm:$0xff] (!%p164_p2)  }
   0x9   : > { %522 = vmatpush1.bf16.msra.mxu1 (!%p164_p2), %v2860_v5  ;;  %v2866_v12 = vld [vmem:[%s3710_s1 + $0xa0] ss:$8 sps:$4 sm:$0xff] (!%p164_p2)   ;;  %v2855_v13 = vld [vmem:[%s3710_s1 + $0x50] ss:$8 sps:$4 sm:$0xff] (!%p164_p2)   ;;  %v2867_v15 = vld [vmem:[%s3710_s1 + $0xb4] ss:$8 sps:$4 sm:$0xff] (!%p164_p2)  }
   0xa   : > { %523 = vmatprep.subr.bf16.mxu1 (!%p164_p2), %v2861_v6  ;;  %v2869_v16 = vld [vmem:[%s3710_s1 + $0xb0] ss:$8 sps:$4 sm:$0xff] (!%p164_p2)   ;;  %v2856_v17 = vld [vmem:[%s3710_s1 + $0x60] ss:$8 sps:$4 sm:$0xff] (!%p164_p2)   ;;  %v2870_v18 = vld [vmem:[%s3710_s1 + $0xc4] ss:$8 sps:$4 sm:$0xff] (!%p164_p2)  }
   0xb   : > { %2588 = vmatpush3.bf16.msra.mxu0 (!%p164_p2), %v2851_v1  ;;  %v2872_v19 = vld [vmem:[%s3710_s1 + $0xc0] ss:$8 sps:$4 sm:$0xff] (!%p164_p2)   ;;  %v2857_v20 = vld [vmem:[%s3710_s1 + $0x70] ss:$8 sps:$4 sm:$0xff] (!%p164_p2)   ;;  %v2873_v21 = vld [vmem:[%s3710_s1 + $0xd4] ss:$8 sps:$4 sm:$0xff] (!%p164_p2)  }
   0xc   : > { %2589 = vmatprep.subr.bf16.mxu0 (!%p164_p2), %v2852_v2  ;;  %v2875_v24 = vld [vmem:[%s3710_s1 + $0xd0] ss:$8 sps:$4 sm:$0xff] (!%p164_p2)   ;;  %v2876_v44 = vld [vmem:[%s3710_s1 + $0xe4] ss:$8 sps:$4 sm:$0xff] (!%p164_p2)   ;;  %v2878_v45 = vld [vmem:[%s3710_s1 + $0xe0] ss:$8 sps:$4 sm:$0xff] (!%p164_p2)  }
   0xd   : > { %s3715_s25 = smov (!%p190_p3, %s2305_s25), 63  ;;  %524 = vmatpush1.bf16.msra.mxu1 %v2863_v8  ;;  %v2879_v46 = vld [vmem:[%s3710_s1 + $0xf4] ss:$8 sps:$4 sm:$0xff]   ;;  %v2881_v47 = vld [vmem:[%s3710_s1 + $0xf0] ss:$8 sps:$4 sm:$0xff]  }
   0xe   : > { %s2306_s12 = sshll.u32 %s3715_s25, 3  ;;  %525 = vmatprep.subr.bf16.mxu1 %v2864_v9  ;;  %v2882_v49 = vld [vmem:[%s3710_s1 + $0x100] ss:$8 sps:$4 sm:$0xff]   ;;  %v2884_v50 = vld [vmem:[%s3710_s1 + $0x104] ss:$8 sps:$4 sm:$0xff]  }
   0xf   : > { %2590 = vmatpush3.bf16.msra.mxu0 %v2852_v2  ;;  %s3082_s16 = scalar_lea.vmem %s3709_s0, %s2306_s12  ;;  %v2887_v51 = vld [vmem:[%s3710_s1 + $0x114] ss:$8 sps:$4 sm:$0xff]   ;;  %v2885_v52 = vld [vmem:[%s3710_s1 + $0x110] ss:$8 sps:$4 sm:$0xff]   ;;  %v2890_v53 = vld [vmem:[%s3710_s1 + $0x124] ss:$8 sps:$4 sm:$0xff]   ;;  %s3651_s21 = scalar_lea.vmem %s3713_s4, %s2306_s12 }
  0x10   : > { %2591 = vmatprep.subr.bf16.mxu0 %v2853_v3  ;;  %v202_v10 = vld [vmem:[%s3082_s16] sm:$0xff]  ;;  %v203_v11 = vld [vmem:[%s3082_s16 + $0x8] sm:$0xff]  ;;  %v204_v22 = vld [vmem:[%s3082_s16 + $0x10] sm:$0xff] }
  0x11   : > { %v3092_v14 = vpack.c.bf16 %v203_v11, %v202_v10  ;;  %526 = vmatpush1.bf16.msra.mxu1 %v2866_v12  ;;  %v205_v23 = vld [vmem:[%s3082_s16 + $0x18] sm:$0xff]  ;;  %v206_v25 = vld [vmem:[%s3082_s16 + $0x20] sm:$0xff]  ;;  %v207_v26 = vld [vmem:[%s3082_s16 + $0x28] sm:$0xff] }
  0x12   : > { %527 = vmatprep.subr.bf16.mxu1 %v2867_v15  ;;  %v3123_v27 = vpack.c.bf16 %v205_v23, %v204_v22  ;;  %v3125_v28 = vpack.c.bf16 %v207_v26, %v206_v25  ;;  %v208_v29 = vld [vmem:[%s3082_s16 + $0x30] sm:$0xff]  ;;  %v209_v30 = vld [vmem:[%s3082_s16 + $0x38] sm:$0xff]  ;;  %v210_v31 = vld [vmem:[%s3082_s16 + $0x40] sm:$0xff] }
  0x13   : > { %2592 = vmatpush3.bf16.msra.mxu0 %v2853_v3  ;;  %2601 = vmatprep.mubr.bf16.mxu0 %v3092_v14  ;;  %v211_v32 = vld [vmem:[%s3082_s16 + $0x48] sm:$0xff]  ;;  %v3133_v33 = vpack.c.bf16 %v209_v30, %v208_v29  ;;  %v212_v35 = vld [vmem:[%s3082_s16 + $0x50] sm:$0xff]  ;;  %v213_v36 = vld [vmem:[%s3082_s16 + $0x58] sm:$0xff] }
  0x14   : > { %2593 = vmatprep.subr.bf16.mxu0 %v2854_v7  ;;  %v3135_v34 = vpack.c.bf16 %v211_v32, %v210_v31  ;;  %v214_v37 = vld [vmem:[%s3082_s16 + $0x60] sm:$0xff]  ;;  %v215_v38 = vld [vmem:[%s3082_s16 + $0x68] sm:$0xff]  ;;  %v3143_v39 = vpack.c.bf16 %v213_v36, %v212_v35  ;;  %v216_v41 = vld [vmem:[%s3082_s16 + $0x70] sm:$0xff] }
  0x15   : > { %528 = vmatpush1.bf16.msra.mxu1 %v2869_v16  ;;  %v3145_v40 = vpack.c.bf16 %v215_v38, %v214_v37  ;;  %v217_v42 = vld [vmem:[%s3082_s16 + $0x78] sm:$0xff]  ;;  %v2888_v54 = vld [vmem:[%s3710_s1 + $0x120] ss:$8 sps:$4 sm:$0xff]   ;;  %v2896_v57 = vld [vmem:[%s3710_s1 + $0x144] ss:$8 sps:$4 sm:$0xff]  }
  0x16   : > { %529 = vmatprep.subr.bf16.mxu1 %v2870_v18  ;;  %v3151_v43 = vpack.c.bf16 %v217_v42, %v216_v41  ;;  %v2893_v55 = vld [vmem:[%s3710_s1 + $0x134] ss:$8 sps:$4 sm:$0xff]   ;;  %v2891_v56 = vld [vmem:[%s3710_s1 + $0x130] ss:$8 sps:$4 sm:$0xff]   ;;  %v2894_v58 = vld [vmem:[%s3710_s1 + $0x140] ss:$8 sps:$4 sm:$0xff]  }
  0x17   : > { %2594 = vmatpush3.bf16.msra.mxu0 %v2854_v7  ;;  %v2899_v59 = vld [vmem:[%s3710_s1 + $0x154] ss:$8 sps:$4 sm:$0xff]   ;;  %v2897_v60 = vld [vmem:[%s3710_s1 + $0x150] ss:$8 sps:$4 sm:$0xff]   ;;  %v2902_v61 = vld [vmem:[%s3710_s1 + $0x164] ss:$8 sps:$4 sm:$0xff]  }
  0x18   : > { %2595 = vmatprep.subr.bf16.mxu0 %v2855_v13  ;;  %v2900_v62 = vld [vmem:[%s3710_s1 + $0x160] ss:$8 sps:$4 sm:$0xff]   ;;  %v2905_v63 = vld [vmem:[%s3710_s1 + $0x174] ss:$8 sps:$4 sm:$0xff]   ;;  %v2903_v0 = vld [vmem:[%s3710_s1 + $0x170] ss:$8 sps:$4 sm:$0xff]  }
  0x19   : > { %530 = vmatpush1.bf16.msra.mxu1 %v2872_v19  ;;  %v2908_v1 = vld [vmem:[%s3710_s1 + $0x184] ss:$8 sps:$4 sm:$0xff]   ;;  %v2906_v2 = vld [vmem:[%s3710_s1 + $0x180] ss:$8 sps:$4 sm:$0xff]   ;;  %v2911_v3 = vld [vmem:[%s3710_s1 + $0x194] ss:$8 sps:$4 sm:$0xff]  }
  0x1a   : > { %531 = vmatprep.subr.bf16.mxu1 %v2873_v21  ;;  %v2909_v4 = vld [vmem:[%s3710_s1 + $0x190] ss:$8 sps:$4 sm:$0xff]   ;;  %v2914_v5 = vld [vmem:[%s3710_s1 + $0x1a4] ss:$8 sps:$4 sm:$0xff]   ;;  %v2912_v6 = vld [vmem:[%s3710_s1 + $0x1a0] ss:$8 sps:$4 sm:$0xff]  }
  0x1b   : > { %2596 = vmatpush3.bf16.msra.mxu0 %v2855_v13  ;;  %v2917_v7 = vld [vmem:[%s3710_s1 + $0x1b4] ss:$8 sps:$4 sm:$0xff]   ;;  %v2915_v8 = vld [vmem:[%s3710_s1 + $0x1b0] ss:$8 sps:$4 sm:$0xff]   ;;  %v2920_v9 = vld [vmem:[%s3710_s1 + $0x1c4] ss:$8 sps:$4 sm:$0xff]  }
  0x1c   : > { %2597 = vmatprep.subr.bf16.mxu0 %v2856_v17  ;;  %v2918_v10 = vld [vmem:[%s3710_s1 + $0x1c0] ss:$8 sps:$4 sm:$0xff]   ;;  %v2923_v11 = vld [vmem:[%s3710_s1 + $0x1d4] ss:$8 sps:$4 sm:$0xff]   ;;  %v2921_v12 = vld [vmem:[%s3710_s1 + $0x1d0] ss:$8 sps:$4 sm:$0xff]  }
  0x1d   : > { %532 = vmatpush1.bf16.msra.mxu1 %v2875_v24  ;;  %v234_v13 = vld [vmem:[%s3712_s3] ss:$0 sm:$0xff] }
  0x1e   : > { %533 = vmatprep.subr.bf16.mxu1 %v2876_v44 }
  0x1f   : > { %2598 = vmatpush3.bf16.msra.mxu0 %v2856_v17 }
  0x20   : > { %2599 = vmatprep.subr.bf16.mxu0 %v2857_v20 }
  0x21   : > { %534 = vmatpush1.bf16.msra.mxu1 %v2878_v45 }
  0x22   : > { %535 = vmatprep.subr.bf16.mxu1 %v2879_v46 }
  0x23   : > { %2600 = vmatpush3.bf16.msra.mxu0 %v2857_v20 }
  0x24   : > { %887 = vmatprep.subr.bf16.mxu0 %v2884_v50 }
  0x25   : > { %536 = vmatpush1.bf16.msra.mxu1 %v2881_v47 }
  0x26   : > { %2602 = vmatmul.mubr.bf16.vlgmr.msra.gmra.mrb[0].mxu0 %v3123_v27 }
  0x27   : > { %2605 = vmatprep.mubr.bf16.mxu0 %v3125_v28  ;;  %888 = vmatpush1.bf16.msra.mxu0 %v2882_v49 }
  0x28   : > { %889 = vmatprep.subr.bf16.mxu0 %v2887_v51 }
  0x2b   : > { %890 = vmatpush1.bf16.msra.mxu0 %v2885_v52 }
  0x2c   : > { %891 = vmatprep.subr.bf16.mxu0 %v2890_v53 }
  0x2e   : > { %2606 = vmatmul.mubr.bf16.gmra.mrb[4].mxu0 %v3133_v33 }
  0x2f   : > { %2609 = vmatprep.mubr.bf16.mxu0 %v3135_v34  ;;  %892 = vmatpush1.bf16.msra.mxu0 %v2888_v54 }
  0x30   : > { %893 = vmatprep.subr.bf16.mxu0 %v2893_v55 }
  0x33   : > { %894 = vmatpush1.bf16.msra.mxu0 %v2891_v56 }
  0x34   : > { %895 = vmatprep.subr.bf16.mxu0 %v2896_v57 }
  0x36   : > { %2610 = vmatmul.mubr.bf16.gmra.mrb[8].mxu0 %v3143_v39 }
  0x37   : > { %2613 = vmatprep.mubr.bf16.mxu0 %v3145_v40  ;;  %896 = vmatpush1.bf16.msra.mxu0 %v2894_v58 }
  0x38   : > { %897 = vmatprep.subr.bf16.mxu0 %v2899_v59 }
  0x3b   : > { %898 = vmatpush1.bf16.msra.mxu0 %v2897_v60 }
  0x3c   : > { %899 = vmatprep.subr.bf16.mxu0 %v2902_v61 }
  0x3e   : > { %2614 = vmatmul.mubr.bf16.gmra.mrb[12].mxu0 %v3151_v43 }
  0x3f   : > { %900 = vmatpush1.bf16.msra.mxu0 %v2900_v62 }
  0x40   : > { %901 = vmatprep.subr.bf16.mxu0 %v2905_v63 }
  0x43   : > { %902 = vmatpush1.bf16.msra.mxu0 %v2903_v0 }
  0x44   : > { %903 = vmatprep.subr.bf16.mxu0 %v2908_v1 }
  0x47   : > { %904 = vmatpush1.bf16.msra.mxu0 %v2906_v2 }
  0x48   : > { %905 = vmatprep.subr.bf16.mxu0 %v2911_v3 }
  0x4b   : > { %906 = vmatpush1.bf16.msra.mxu0 %v2909_v4 }
  0x4c   : > { %907 = vmatprep.subr.bf16.mxu0 %v2914_v5 }
  0x4f   : > { %908 = vmatpush1.bf16.msra.mxu0 %v2912_v6 }
  0x50   : > { %909 = vmatprep.subr.bf16.mxu0 %v2917_v7 }
  0x53   : > { %910 = vmatpush1.bf16.msra.mxu0 %v2915_v8 }
  0x54   : > { %911 = vmatprep.subr.bf16.mxu0 %v2920_v9 }
  0x57   : > { %912 = vmatpush1.bf16.msra.mxu0 %v2918_v10 }
  0x58   : > { %913 = vmatprep.subr.bf16.mxu0 %v2923_v11 }
  0x5b   : > { %914 = vmatpush1.bf16.msra.mxu0 %v2921_v12 }
  0xf9   : > { %v2603_v15 = vpop.f32.mrb[0].mxu0 }
  0xfa   : > { %v334_v16 = vadd.f32 %v2603_v15, %v234_v13  ;;  %v325_v17 = vpop.f32.mrb[1].mxu0 }
  0xfb   : > { %v326_v18 = vadd.f32 %v325_v17, %v234_v13  ;;  %v2604_v19 = vpop.f32.mrb[2].mxu0  ;;  %v2924_v17 = vld [vmem:[%s3710_s1 + $0x1e0] ss:$8 sps:$4 sm:$0xff]  }
  0xfc   : > { %v337_v20 = vadd.f32 %v2604_v19, %v234_v13  ;;  %v328_v21 = vpop.f32.mrb[3].mxu0  ;;  %v390_v23 = vmax.f32 %v334_v16, 0.0  ;;  %v2927_v19 = vld [vmem:[%s3710_s1 + $0x1f0] ss:$8 sps:$4 sm:$0xff]  }
  0xfd   : > { %v329_v22 = vadd.f32 %v328_v21, %v234_v13  ;;  %v388_v25 = vmax.f32 %v326_v18, 0.0  ;;  %v2929_v18 = vld [vmem:[%s3710_s1 + $0x1f4] ss:$8 sps:$4 sm:$0xff]   ;;  %v2932_v21 = vld [vmem:[%s3710_s1 + $0x290] ss:$8 sps:$4 sm:$0xff]  }
  0xfe   : > { %v391_v24 = vmax.f32 %v337_v20, 0.0  ;;  %v2931_v20 = vld [vmem:[%s3710_s1 + $0x200] ss:$8 sps:$4 sm:$0xff]  }
  0xff   : > { %v389_v26 = vmax.f32 %v329_v22, 0.0  ;;  %v2933_v22 = vld [vmem:[%s3710_s1 + $0x210] ss:$8 sps:$4 sm:$0xff]  }
 0x100   : > { %v423_v29 = vpack.c.bf16 %v391_v24, %v390_v23  ;;  %v2934_v23 = vld [vmem:[%s3710_s1 + $0x2a0] ss:$8 sps:$4 sm:$0xff]  }
 0x101   : > { %v422_v30 = vpack.c.bf16 %v389_v26, %v388_v25  ;;  %v2607_v31 = vpop.f32.mrb[4].mxu0  ;;  %v2935_v24 = vld [vmem:[%s3710_s1 + $0x220] ss:$8 sps:$4 sm:$0xff]   ;;  %v2936_v25 = vld [vmem:[%s3710_s1 + $0x2b0] ss:$8 sps:$4 sm:$0xff]  }
 0x102   : > { %v350_v32 = vadd.f32 %v2607_v31, %v234_v13  ;;  %v341_v35 = vpop.f32.mrb[5].mxu0  ;;  %v2937_v26 = vld [vmem:[%s3710_s1 + $0x230] ss:$8 sps:$4 sm:$0xff]  }
 0x103   : > { %554 = vmatmul.mubr.bf16.vlgmr.msra.gmra.mrb[0].mxu1 %v422_v30  ;;  %v342_v36 = vadd.f32 %v341_v35, %v234_v13  ;;  %v2608_v37 = vpop.f32.mrb[6].mxu0  ;;  %v2939_v30 = vld [vmem:[%s3710_s1 + $0x240] ss:$8 sps:$4 sm:$0xff]   ;;  %v2940_v31 = vld [vmem:[%s3710_s1 + $0x2d0] ss:$8 sps:$4 sm:$0xff]  }
 0x104   : > { %v394_v38 = vmax.f32 %v350_v32, 0.0  ;;  %v353_v41 = vadd.f32 %v2608_v37, %v234_v13  ;;  %v344_v42 = vpop.f32.mrb[7].mxu0  ;;  %563 = vmatprep.mubr.bf16.mxu1 %v3010_v48  ;;  %v2941_v32 = vld [vmem:[%s3710_s1 + $0x250] ss:$8 sps:$4 sm:$0xff]   ;;  %v2942_v35 = vld [vmem:[%s3710_s1 + $0x2e0] ss:$8 sps:$4 sm:$0xff]   ;;  %v431_v37 = vlaneseq }
 0x105   : > { %v392_v44 = vmax.f32 %v342_v36, 0.0  ;;  %v345_v45 = vadd.f32 %v344_v42, %v234_v13  ;;  %v2943_v36 = vld [vmem:[%s3710_s1 + $0x260] ss:$8 sps:$4 sm:$0xff]   ;;  %v2317_v42 = vld [vmem:[%s3712_s3 + $0x10] ss:$8 sm:$0x3] }
 0x106   : > { %v395_v46 = vmax.f32 %v353_v41, 0.0 }
 0x107   : > { %v393_v47 = vmax.f32 %v345_v45, 0.0 }
 0x108   : > { %v425_v49 = vpack.c.bf16 %v395_v46, %v394_v38  ;;  %v3315_v38 = vshrl.u32 %v431_v37, 7 }
 0x109   : > { %v424_v50 = vpack.c.bf16 %v393_v47, %v392_v44  ;;  %v2611_v51 = vpop.f32.mrb[8].mxu0 }
 0x10a   : > { %v366_v52 = vadd.f32 %v2611_v51, %v234_v13  ;;  %v357_v53 = vpop.f32.mrb[9].mxu0  ;;  %v433_v41 = vsub.s32 0, %v3315_v38  ;;  %v437_v44 = vsub.s32 1, %v3315_v38 }
 0x10b   : > { %564 = vmatmul.mubr.bf16.gmra.mrb[4].mxu1 %v423_v29  ;;  %v358_v54 = vadd.f32 %v357_v53, %v234_v13  ;;  %v2612_v55 = vpop.f32.mrb[10].mxu0  ;;  %v2938_v29 = vld [vmem:[%s3710_s1 + $0x2c0] ss:$8 sps:$4 sm:$0xff]  }
 0x10c   : > { %573 = vmatprep.mubr.bf16.mxu1 %v3010_v48  ;;  %v398_v56 = vmax.f32 %v366_v52, 0.0  ;;  %v369_v57 = vadd.f32 %v2612_v55, %v234_v13  ;;  %v360_v58 = vpop.f32.mrb[11].mxu0  ;;  %v3324_v45 = vrot.slane %v2317_v42, %v433_v41  ;;  %v3328_v46 = vrot.slane %v2317_v42, %v437_v44 }
 0x10d   : > { %v396_v59 = vmax.f32 %v358_v54, 0.0  ;;  %v361_v60 = vadd.f32 %v360_v58, %v234_v13 }
 0x10e   : > { %v399_v61 = vmax.f32 %v369_v57, 0.0 }
 0x10f   : > { %v397_v62 = vmax.f32 %v361_v60, 0.0 }
 0x110   : > { %v427_v63 = vpack.c.bf16 %v399_v61, %v398_v56 }
 0x111   : > { %v426_v0 = vpack.c.bf16 %v397_v62, %v396_v59  ;;  %v2615_v1 = vpop.f32.mrb[12].mxu0 }
 0x112   : > { %v382_v2 = vadd.f32 %v2615_v1, %v234_v13  ;;  %v373_v3 = vpop.f32.mrb[13].mxu0 }
 0x113   : > { %574 = vmatmul.mubr.bf16.gmra.mrb[8].mxu1 %v424_v50  ;;  %v374_v4 = vadd.f32 %v373_v3, %v234_v13  ;;  %v2616_v5 = vpop.f32.mrb[14].mxu0 }
 0x114   : > { %583 = vmatprep.mubr.bf16.mxu1 %v3010_v48  ;;  %v402_v6 = vmax.f32 %v382_v2, 0.0  ;;  %v385_v7 = vadd.f32 %v2616_v5, %v234_v13  ;;  %v376_v8 = vpop.f32.mrb[15].mxu0 }
 0x115   : > { %v400_v9 = vmax.f32 %v374_v4, 0.0  ;;  %v377_v10 = vadd.f32 %v376_v8, %v234_v13  ;;  %v2926_v13 = vld [vmem:[%s3710_s1 + $0x1e4] ss:$8 sps:$4 sm:$0xff]  }
 0x116   : > { %v403_v11 = vmax.f32 %v385_v7, 0.0  ;;  %915 = vmatprep.subr.bf16.mxu0 %v2926_v13 }
 0x117   : > { %v401_v12 = vmax.f32 %v377_v10, 0.0  ;;  %916 = vmatpush1.bf16.msra.mxu0 %v2924_v17 }
 0x118   : > { %v429_v15 = vpack.c.bf16 %v403_v11, %v402_v6  ;;  %917 = vmatprep.subr.bf16.mxu0 %v2929_v18 }
 0x119   : > { %v428_v16 = vpack.c.bf16 %v401_v12, %v400_v9 }
 0x11b   : > { %584 = vmatmul.mubr.bf16.gmra.mrb[12].mxu1 %v425_v49  ;;  %918 = vmatpush1.bf16.msra.mxu0 %v2927_v19 }
 0x11c   : > { %593 = vmatprep.mubr.bf16.mxu1 %v3010_v48 }
 0x123   : > { %594 = vmatmul.mubr.bf16.gmra.mrb[16].mxu1 %v426_v0 }
 0x124   : > { %603 = vmatprep.mubr.bf16.mxu1 %v3010_v48 }
 0x12b   : > { %604 = vmatmul.mubr.bf16.gmra.mrb[20].mxu1 %v427_v63 }
 0x12c   : > { %613 = vmatprep.mubr.bf16.mxu1 %v3010_v48 }
 0x133   : > { %614 = vmatmul.mubr.bf16.gmra.mrb[24].mxu1 %v428_v16 }
 0x134   : > { %623 = vmatprep.mubr.bf16.mxu1 %v3010_v48  ;;  %v2930_v48 = vld [vmem:[%s3710_s1 + $0x280] ss:$8 sps:$4 sm:$0xff]  }
 0x135   : > { %2441 = vmatprep.subr.bf16.mxu1 %v2930_v48 }
 0x136   : > { %2442 = vmatpush3.bf16.msra.mxu1 %v2931_v20 }
 0x137   : > { %2443 = vmatprep.subr.bf16.mxu1 %v2932_v21 }
 0x13a   : > { %2444 = vmatpush3.bf16.msra.mxu1 %v2933_v22 }
 0x13b   : > { %624 = vmatmul.mubr.bf16.gmra.mrb[28].mxu1 %v429_v15  ;;  %2445 = vmatprep.subr.bf16.mxu1 %v2934_v23 }
 0x13e   : > { %2446 = vmatpush3.bf16.msra.mxu1 %v2935_v24 }
 0x13f   : > { %2447 = vmatprep.subr.bf16.mxu1 %v2936_v25 }
 0x142   : > { %2448 = vmatpush3.bf16.msra.mxu1 %v2937_v26 }
 0x143   : > { %2449 = vmatprep.subr.bf16.mxu1 %v2938_v29 }
 0x146   : > { %2450 = vmatpush3.bf16.msra.mxu1 %v2939_v30 }
 0x147   : > { %2451 = vmatprep.subr.bf16.mxu1 %v2940_v31 }
 0x14a   : > { %2452 = vmatpush3.bf16.msra.mxu1 %v2941_v32 }
 0x14b   : > { %2453 = vmatprep.subr.bf16.mxu1 %v2942_v35 }
 0x14e   : > { %2454 = vmatpush3.bf16.msra.mxu1 %v2943_v36 }
 0x1d6   : > { %v555_v47 = vpop.f32.mrb[0].mxu1 }
 0x1d7   : > { %v556_v49 = vadd.f32 %v555_v47, %v3324_v45  ;;  %v557_v50 = vpop.f32.mrb[1].mxu1 }
 0x1d8   : > { %v558_v51 = vadd.f32 %v557_v50, %v3328_v46  ;;  %v559_v52 = vpop.f32.mrb[2].mxu1 }
 0x1d9   : > { %v560_v53 = vadd.f32 %v559_v52, %v3324_v45  ;;  %v561_v54 = vpop.f32.mrb[3].mxu1  ;;  %v634_v56 = vmax.f32 %v556_v49, 0.0 }
 0x1da   : > { %v562_v55 = vadd.f32 %v561_v54, %v3328_v46  ;;  %v635_v58 = vmax.f32 %v558_v51, 0.0 }
 0x1db   : > { %v636_v57 = vmax.f32 %v560_v53, 0.0 }
 0x1dc   : > { %v637_v59 = vmax.f32 %v562_v55, 0.0 }
 0x1dd   : > { %v700_v60 = vpack.c.bf16 %v636_v57, %v634_v56 }
 0x1de   : > { %v701_v61 = vpack.c.bf16 %v637_v59, %v635_v58  ;;  %v565_v62 = vpop.f32.mrb[4].mxu1 }
 0x1df   : > { %v566_v63 = vadd.f32 %v565_v62, %v3324_v45  ;;  %v567_v0 = vpop.f32.mrb[5].mxu1 }
 0x1e0   : > { %v568_v1 = vadd.f32 %v567_v0, %v3328_v46  ;;  %v569_v2 = vpop.f32.mrb[6].mxu1  ;;  %919 = vmatprep.mubr.bf16.mxu0 %v701_v61 }
 0x1e1   : > { %v570_v3 = vadd.f32 %v569_v2, %v3324_v45  ;;  %v571_v4 = vpop.f32.mrb[7].mxu1  ;;  %920 = vmatmul.mubr.bf16.vlgmr.msra.gmra.mrb[16].mxu0 %v700_v60  ;;  %v638_v6 = vmax.f32 %v566_v63, 0.0 }
 0x1e2   : > { %v572_v5 = vadd.f32 %v571_v4, %v3328_v46  ;;  %v639_v8 = vmax.f32 %v568_v1, 0.0 }
 0x1e3   : > { %v640_v7 = vmax.f32 %v570_v3, 0.0 }
 0x1e4   : > { %v641_v9 = vmax.f32 %v572_v5, 0.0 }
 0x1e5   : > { %v702_v10 = vpack.c.bf16 %v640_v7, %v638_v6 }
 0x1e6   : > { %v703_v11 = vpack.c.bf16 %v641_v9, %v639_v8  ;;  %v575_v12 = vpop.f32.mrb[8].mxu1 }
 0x1e7   : > { %v576_v15 = vadd.f32 %v575_v12, %v3324_v45  ;;  %v577_v16 = vpop.f32.mrb[9].mxu1 }
 0x1e8   : > { %v578_v13 = vadd.f32 %v577_v16, %v3328_v46  ;;  %v579_v17 = vpop.f32.mrb[10].mxu1  ;;  %929 = vmatprep.mubr.bf16.mxu0 %v703_v11 }
 0x1e9   : > { %v580_v18 = vadd.f32 %v579_v17, %v3324_v45  ;;  %v581_v19 = vpop.f32.mrb[11].mxu1  ;;  %930 = vmatmul.mubr.bf16.gmra.mrb[20].mxu0 %v702_v10  ;;  %v642_v20 = vmax.f32 %v576_v15, 0.0 }
 0x1ea   : > { %v582_v48 = vadd.f32 %v581_v19, %v3328_v46  ;;  %v643_v22 = vmax.f32 %v578_v13, 0.0 }
 0x1eb   : > { %v644_v21 = vmax.f32 %v580_v18, 0.0 }
 0x1ec   : > { %v645_v23 = vmax.f32 %v582_v48, 0.0 }
 0x1ed   : > { %v704_v24 = vpack.c.bf16 %v644_v21, %v642_v20 }
 0x1ee   : > { %v705_v25 = vpack.c.bf16 %v645_v23, %v643_v22  ;;  %v585_v26 = vpop.f32.mrb[12].mxu1 }
 0x1ef   : > { %v586_v29 = vadd.f32 %v585_v26, %v3324_v45  ;;  %v587_v30 = vpop.f32.mrb[13].mxu1 }
 0x1f0   : > { %v588_v31 = vadd.f32 %v587_v30, %v3328_v46  ;;  %v589_v32 = vpop.f32.mrb[14].mxu1  ;;  %939 = vmatprep.mubr.bf16.mxu0 %v705_v25 }
 0x1f1   : > { %v590_v35 = vadd.f32 %v589_v32, %v3324_v45  ;;  %v591_v36 = vpop.f32.mrb[15].mxu1  ;;  %940 = vmatmul.mubr.bf16.gmra.mrb[24].mxu0 %v704_v24  ;;  %v646_v42 = vmax.f32 %v586_v29, 0.0 }
 0x1f2   : > { %v592_v37 = vadd.f32 %v591_v36, %v3328_v46  ;;  %v647_v49 = vmax.f32 %v588_v31, 0.0 }
 0x1f3   : > { %v648_v47 = vmax.f32 %v590_v35, 0.0 }
 0x1f4   : > { %v649_v50 = vmax.f32 %v592_v37, 0.0 }
 0x1f5   : > { %v706_v51 = vpack.c.bf16 %v648_v47, %v646_v42 }
 0x1f6   : > { %v707_v52 = vpack.c.bf16 %v649_v50, %v647_v49  ;;  %v595_v53 = vpop.f32.mrb[16].mxu1 }
 0x1f7   : > { %v596_v54 = vadd.f32 %v595_v53, %v3324_v45  ;;  %v597_v55 = vpop.f32.mrb[17].mxu1 }
 0x1f8   : > { %v598_v56 = vadd.f32 %v597_v55, %v3328_v46  ;;  %v599_v57 = vpop.f32.mrb[18].mxu1  ;;  %949 = vmatprep.mubr.bf16.mxu0 %v707_v52 }
 0x1f9   : > { %v600_v58 = vadd.f32 %v599_v57, %v3324_v45  ;;  %v601_v59 = vpop.f32.mrb[19].mxu1  ;;  %950 = vmatmul.mubr.bf16.gmra.mrb[28].mxu0 %v706_v51  ;;  %v650_v61 = vmax.f32 %v596_v54, 0.0 }
 0x1fa   : > { %v602_v60 = vadd.f32 %v601_v59, %v3328_v46  ;;  %v651_v63 = vmax.f32 %v598_v56, 0.0  ;;  %v2954_v59 = vld [vmem:[%s3710_s1 + $0x300] ss:$8 sps:$4 sm:$0xff]  }
 0x1fb   : > { %v652_v62 = vmax.f32 %v600_v58, 0.0  ;;  %v2944_v58 = vld [vmem:[%s3710_s1 + $0x2f0] ss:$8 sps:$4 sm:$0xff]   ;;  %2617 = vmatprep.subr.bf16.mxu0 %v2954_v59 }
 0x1fc   : > { %v653_v0 = vmax.f32 %v602_v60, 0.0  ;;  %2455 = vmatprep.subr.bf16.mxu1 %v2944_v58  ;;  %v2955_v60 = vld [vmem:[%s3710_s1 + $0x310] ss:$8 sps:$4 sm:$0xff]   ;;  %2618 = vmatpush3.bf16.msra.mxu0 %v2954_v59 }
 0x1fd   : > { %v708_v1 = vpack.c.bf16 %v652_v62, %v650_v61  ;;  %2619 = vmatprep.subr.bf16.mxu0 %v2955_v60  ;;  %v2956_v61 = vld [vmem:[%s3710_s1 + $0x320] ss:$8 sps:$4 sm:$0xff]  }
 0x1fe   : > { %v709_v2 = vpack.c.bf16 %v653_v0, %v651_v63  ;;  %v605_v3 = vpop.f32.mrb[20].mxu1  ;;  %v2334_v62 = vld [vmem:[%s3712_s3 + $0x20] ss:$8 sm:$0x3] }
 0x1ff   : > { %v606_v4 = vadd.f32 %v605_v3, %v3324_v45  ;;  %v607_v5 = vpop.f32.mrb[21].mxu1  ;;  %v3385_v63 = vrot.slane %v2334_v62, %v433_v41  ;;  %v3389_v0 = vrot.slane %v2334_v62, %v437_v44 }
 0x200   : > { %v608_v6 = vadd.f32 %v607_v5, %v3328_v46  ;;  %v609_v7 = vpop.f32.mrb[22].mxu1  ;;  %959 = vmatprep.mubr.bf16.mxu0 %v709_v2  ;;  %2620 = vmatpush3.bf16.msra.mxu0 %v2955_v60 }
 0x201   : > { %v610_v8 = vadd.f32 %v609_v7, %v3324_v45  ;;  %v611_v9 = vpop.f32.mrb[23].mxu1  ;;  %960 = vmatmul.mubr.bf16.gmra.mrb[32].mxu0 %v708_v1  ;;  %v654_v11 = vmax.f32 %v606_v4, 0.0  ;;  %2621 = vmatprep.subr.bf16.mxu0 %v2956_v61 }
 0x202   : > { %v612_v10 = vadd.f32 %v611_v9, %v3328_v46  ;;  %v655_v15 = vmax.f32 %v608_v6, 0.0 }
 0x203   : > { %v656_v12 = vmax.f32 %v610_v8, 0.0 }
 0x204   : > { %v657_v16 = vmax.f32 %v612_v10, 0.0  ;;  %2622 = vmatpush3.bf16.msra.mxu0 %v2956_v61 }
 0x205   : > { %v710_v13 = vpack.c.bf16 %v656_v12, %v654_v11 }
 0x206   : > { %v711_v17 = vpack.c.bf16 %v657_v16, %v655_v15  ;;  %v615_v18 = vpop.f32.mrb[24].mxu1 }
 0x207   : > { %v616_v19 = vadd.f32 %v615_v18, %v3324_v45  ;;  %v617_v48 = vpop.f32.mrb[25].mxu1 }
 0x208   : > { %v618_v20 = vadd.f32 %v617_v48, %v3328_v46  ;;  %v619_v21 = vpop.f32.mrb[26].mxu1  ;;  %969 = vmatprep.mubr.bf16.mxu0 %v711_v17 }
 0x209   : > { %v620_v22 = vadd.f32 %v619_v21, %v3324_v45  ;;  %v621_v23 = vpop.f32.mrb[27].mxu1  ;;  %970 = vmatmul.mubr.bf16.gmra.mrb[36].mxu0 %v710_v13  ;;  %v658_v25 = vmax.f32 %v616_v19, 0.0  ;;  %v2947_v13 = vld [vmem:[%s3711_s2 + $0x8] sm:$0xff]  }
 0x20a   : > { %v622_v24 = vadd.f32 %v621_v23, %v3328_v46  ;;  %v659_v29 = vmax.f32 %v618_v20, 0.0  ;;  %v2948_v23 = vld [vmem:[%s3711_s2 + $0x10] sm:$0xff]  }
 0x20b   : > { %v660_v26 = vmax.f32 %v620_v22, 0.0 }
 0x20c   : > { %v661_v30 = vmax.f32 %v622_v24, 0.0 }
 0x20d   : > { %v712_v31 = vpack.c.bf16 %v660_v26, %v658_v25 }
 0x20e   : > { %v713_v32 = vpack.c.bf16 %v661_v30, %v659_v29  ;;  %v625_v35 = vpop.f32.mrb[28].mxu1 }
 0x20f   : > { %v626_v36 = vadd.f32 %v625_v35, %v3324_v45  ;;  %v627_v37 = vpop.f32.mrb[29].mxu1  ;;  %v2949_v35 = vld [vmem:[%s3711_s2 + $0x18] sm:$0xff]  }
 0x210   : > { %v628_v42 = vadd.f32 %v627_v37, %v3328_v46  ;;  %v629_v47 = vpop.f32.mrb[30].mxu1  ;;  %979 = vmatprep.mubr.bf16.mxu0 %v713_v32 }
 0x211   : > { %v630_v49 = vadd.f32 %v629_v47, %v3324_v45  ;;  %v631_v50 = vpop.f32.mrb[31].mxu1  ;;  %980 = vmatmul.mubr.bf16.gmra.mrb[40].mxu0 %v712_v31  ;;  %v662_v52 = vmax.f32 %v626_v36, 0.0  ;;  %v2945_v45 = vld [vmem:[%s3710_s1 + $0x270] ss:$8 sps:$4 sm:$0xff]  }
 0x212   : > { %v632_v51 = vadd.f32 %v631_v50, %v3328_v46  ;;  %v663_v54 = vmax.f32 %v628_v42, 0.0  ;;  %2456 = vmatpush3.bf16.msra.mxu1 %v2945_v45  ;;  %v2946_v46 = vld [vmem:[%s3711_s2] sm:$0xff]  }
 0x213   : > { %v664_v53 = vmax.f32 %v630_v49, 0.0  ;;  %2649 = vmatprep.subr.bf16.mxu1 %v2946_v46 }
 0x214   : > { %v665_v55 = vmax.f32 %v632_v51, 0.0 }
 0x215   : > { %v714_v56 = vpack.c.bf16 %v664_v53, %v662_v52  ;;  %v2950_v52 = vld [vmem:[%s3711_s2 + $0x20] sm:$0xff]  }
 0x216   : > { %v715_v57 = vpack.c.bf16 %v665_v55, %v663_v54 }
 0x218   : > { %989 = vmatprep.mubr.bf16.mxu0 %v715_v57 }
 0x219   : > { %990 = vmatmul.mubr.bf16.gmra.mrb[44].mxu0 %v714_v56 }
 0x2b4   : > { %v921_v1 = vpop.f32.mrb[16].mxu0 }
 0x2b5   : > { %v922_v2 = vadd.f32 %v921_v1, %v3385_v63  ;;  %v923_v3 = vpop.f32.mrb[17].mxu0 }
 0x2b6   : > { %v924_v4 = vadd.f32 %v923_v3, %v3389_v0  ;;  %v925_v5 = vpop.f32.mrb[18].mxu0 }
 0x2b7   : > { %v926_v6 = vadd.f32 %v925_v5, %v3385_v63  ;;  %v927_v7 = vpop.f32.mrb[19].mxu0  ;;  %v1000_v9 = vmax.f32 %v922_v2, 0.0 }
 0x2b8   : > { %v928_v8 = vadd.f32 %v927_v7, %v3389_v0  ;;  %v1001_v41 = vmax.f32 %v924_v4, 0.0  ;;  %v2952_v4 = vld [vmem:[%s3711_s2 + $0x30] sm:$0xff]  }
 0x2b9   : > { %v1002_v10 = vmax.f32 %v926_v6, 0.0 }
 0x2ba   : > { %v1003_v11 = vmax.f32 %v928_v8, 0.0 }
 0x2bb   : > { %v1065_v12 = vpack.c.bf16 %v1002_v10, %v1000_v9 }
 0x2bc   : > { %v1066_v38 = vpack.c.bf16 %v1003_v11, %v1001_v41  ;;  %v931_v44 = vpop.f32.mrb[20].mxu0  ;;  %v2953_v11 = vld [vmem:[%s3711_s2 + $0x38] sm:$0xff]  }
 0x2bd   : > { %v932_v15 = vadd.f32 %v931_v44, %v3385_v63  ;;  %v933_v16 = vpop.f32.mrb[21].mxu0 }
 0x2be   : > { %v934_v17 = vadd.f32 %v933_v16, %v3389_v0  ;;  %v935_v18 = vpop.f32.mrb[22].mxu0  ;;  %1209 = vmatprep.mubr.bf16.mxu1 %v1066_v38 }
 0x2bf   : > { %v936_v19 = vadd.f32 %v935_v18, %v3385_v63  ;;  %v937_v48 = vpop.f32.mrb[23].mxu0  ;;  %1210 = vmatmul.mubr.bf16.vlgmr.msra.gmra.mrb[32].mxu1 %v1065_v12  ;;  %v1004_v21 = vmax.f32 %v932_v15, 0.0 }
 0x2c0   : > { %v938_v20 = vadd.f32 %v937_v48, %v3389_v0  ;;  %2650 = vmatpush3.bf16.msra.mxu1 %v2946_v46  ;;  %v1005_v24 = vmax.f32 %v934_v17, 0.0  ;;  %v2951_v46 = vld [vmem:[%s3711_s2 + $0x28] sm:$0xff]  }
 0x2c1   : > { %v1006_v22 = vmax.f32 %v936_v19, 0.0  ;;  %2651 = vmatprep.subr.bf16.mxu1 %v2947_v13 }
 0x2c2   : > { %v1007_v25 = vmax.f32 %v938_v20, 0.0 }
 0x2c3   : > { %v1067_v26 = vpack.c.bf16 %v1006_v22, %v1004_v21 }
 0x2c4   : > { %v1068_v29 = vpack.c.bf16 %v1007_v25, %v1005_v24  ;;  %v941_v30 = vpop.f32.mrb[24].mxu0  ;;  %2652 = vmatpush3.bf16.msra.mxu1 %v2947_v13 }
 0x2c5   : > { %v942_v31 = vadd.f32 %v941_v30, %v3385_v63  ;;  %v943_v32 = vpop.f32.mrb[25].mxu0  ;;  %2653 = vmatprep.subr.bf16.mxu1 %v2948_v23 }
 0x2c6   : > { %v944_v36 = vadd.f32 %v943_v32, %v3389_v0  ;;  %v945_v37 = vpop.f32.mrb[26].mxu0  ;;  %1217 = vmatprep.mubr.bf16.mxu1 %v1068_v29 }
 0x2c7   : > { %v946_v42 = vadd.f32 %v945_v37, %v3385_v63  ;;  %v947_v47 = vpop.f32.mrb[27].mxu0  ;;  %1218 = vmatmul.mubr.bf16.gmra.mrb[36].mxu1 %v1067_v26  ;;  %v1008_v50 = vmax.f32 %v942_v31, 0.0 }
 0x2c8   : > { %v948_v49 = vadd.f32 %v947_v47, %v3389_v0  ;;  %2654 = vmatpush3.bf16.msra.mxu1 %v2948_v23  ;;  %v1009_v53 = vmax.f32 %v944_v36, 0.0 }
 0x2c9   : > { %v1010_v51 = vmax.f32 %v946_v42, 0.0  ;;  %2655 = vmatprep.subr.bf16.mxu1 %v2949_v35 }
 0x2ca   : > { %v1011_v54 = vmax.f32 %v948_v49, 0.0 }
 0x2cb   : > { %v1069_v55 = vpack.c.bf16 %v1010_v51, %v1008_v50 }
 0x2cc   : > { %v1070_v56 = vpack.c.bf16 %v1011_v54, %v1009_v53  ;;  %v951_v57 = vpop.f32.mrb[28].mxu0  ;;  %2656 = vmatpush3.bf16.msra.mxu1 %v2949_v35 }
 0x2cd   : > { %v952_v58 = vadd.f32 %v951_v57, %v3385_v63  ;;  %v953_v45 = vpop.f32.mrb[29].mxu0  ;;  %2657 = vmatprep.subr.bf16.mxu1 %v2950_v52 }
 0x2ce   : > { %v954_v59 = vadd.f32 %v953_v45, %v3389_v0  ;;  %v955_v60 = vpop.f32.mrb[30].mxu0  ;;  %1225 = vmatprep.mubr.bf16.mxu1 %v1070_v56 }
 0x2cf   : > { %v956_v61 = vadd.f32 %v955_v60, %v3385_v63  ;;  %v957_v62 = vpop.f32.mrb[31].mxu0  ;;  %1226 = vmatmul.mubr.bf16.gmra.mrb[40].mxu1 %v1069_v55  ;;  %v1012_v2 = vmax.f32 %v952_v58, 0.0 }
 0x2d0   : > { %v958_v1 = vadd.f32 %v957_v62, %v3389_v0  ;;  %2658 = vmatpush3.bf16.msra.mxu1 %v2950_v52  ;;  %v1013_v5 = vmax.f32 %v954_v59, 0.0 }
 0x2d1   : > { %v1014_v3 = vmax.f32 %v956_v61, 0.0  ;;  %2659 = vmatprep.subr.bf16.mxu1 %v2951_v46 }
 0x2d2   : > { %v1015_v6 = vmax.f32 %v958_v1, 0.0 }
 0x2d3   : > { %v1071_v7 = vpack.c.bf16 %v1014_v3, %v1012_v2 }
 0x2d4   : > { %v1072_v8 = vpack.c.bf16 %v1015_v6, %v1013_v5  ;;  %v961_v9 = vpop.f32.mrb[32].mxu0  ;;  %2660 = vmatpush3.bf16.msra.mxu1 %v2951_v46 }
 0x2d5   : > { %v962_v10 = vadd.f32 %v961_v9, %v3385_v63  ;;  %v963_v41 = vpop.f32.mrb[33].mxu0  ;;  %2661 = vmatprep.subr.bf16.mxu1 %v2952_v4 }
 0x2d6   : > { %v964_v12 = vadd.f32 %v963_v41, %v3389_v0  ;;  %v965_v38 = vpop.f32.mrb[34].mxu0  ;;  %1233 = vmatprep.mubr.bf16.mxu1 %v1072_v8 }
 0x2d7   : > { %v966_v44 = vadd.f32 %v965_v38, %v3385_v63  ;;  %v967_v15 = vpop.f32.mrb[35].mxu0  ;;  %1234 = vmatmul.mubr.bf16.gmra.mrb[44].mxu1 %v1071_v7  ;;  %v1016_v13 = vmax.f32 %v962_v10, 0.0 }
 0x2d8   : > { %v968_v16 = vadd.f32 %v967_v15, %v3389_v0  ;;  %2662 = vmatpush3.bf16.msra.mxu1 %v2952_v4  ;;  %v1017_v18 = vmax.f32 %v964_v12, 0.0 }
 0x2d9   : > { %v1018_v17 = vmax.f32 %v966_v44, 0.0  ;;  %2663 = vmatprep.subr.bf16.mxu1 %v2953_v11 }
 0x2da   : > { %v1019_v19 = vmax.f32 %v968_v16, 0.0 }
 0x2db   : > { %v1073_v48 = vpack.c.bf16 %v1018_v17, %v1016_v13 }
 0x2dc   : > { %v1074_v20 = vpack.c.bf16 %v1019_v19, %v1017_v18  ;;  %v971_v21 = vpop.f32.mrb[36].mxu0  ;;  %2664 = vmatpush3.bf16.msra.mxu1 %v2953_v11 }
 0x2dd   : > { %v972_v22 = vadd.f32 %v971_v21, %v3385_v63  ;;  %v973_v23 = vpop.f32.mrb[37].mxu0 }
 0x2de   : > { %v974_v24 = vadd.f32 %v973_v23, %v3389_v0  ;;  %v975_v25 = vpop.f32.mrb[38].mxu0  ;;  %1241 = vmatprep.mubr.bf16.mxu1 %v1074_v20 }
 0x2df   : > { %v976_v26 = vadd.f32 %v975_v25, %v3385_v63  ;;  %v977_v29 = vpop.f32.mrb[39].mxu0  ;;  %1242 = vmatmul.mubr.bf16.gmra.mrb[48].mxu1 %v1073_v48  ;;  %v1020_v31 = vmax.f32 %v972_v22, 0.0 }
 0x2e0   : > { %v978_v30 = vadd.f32 %v977_v29, %v3389_v0  ;;  %v1021_v35 = vmax.f32 %v974_v24, 0.0 }
 0x2e1   : > { %v1022_v32 = vmax.f32 %v976_v26, 0.0 }
 0x2e2   : > { %v1023_v36 = vmax.f32 %v978_v30, 0.0 }
 0x2e3   : > { %v1075_v37 = vpack.c.bf16 %v1022_v32, %v1020_v31 }
 0x2e4   : > { %v1076_v42 = vpack.c.bf16 %v1023_v36, %v1021_v35  ;;  %v981_v47 = vpop.f32.mrb[40].mxu0  ;;  %v2963_v36 = vld [vmem:[%s3711_s2 + $0x48] sm:$0xff]  }
 0x2e5   : > { %v982_v49 = vadd.f32 %v981_v47, %v3385_v63  ;;  %v983_v50 = vpop.f32.mrb[41].mxu0 }
 0x2e6   : > { %v984_v51 = vadd.f32 %v983_v50, %v3389_v0  ;;  %v985_v52 = vpop.f32.mrb[42].mxu0  ;;  %1249 = vmatprep.mubr.bf16.mxu1 %v1076_v42  ;;  %v2964_v50 = vld [vmem:[%s3711_s2 + $0x50] sm:$0xff]  }
 0x2e7   : > { %v986_v53 = vadd.f32 %v985_v52, %v3385_v63  ;;  %v987_v54 = vpop.f32.mrb[43].mxu0  ;;  %1250 = vmatmul.mubr.bf16.gmra.mrb[52].mxu1 %v1075_v37  ;;  %v1024_v56 = vmax.f32 %v982_v49, 0.0 }
 0x2e8   : > { %v988_v55 = vadd.f32 %v987_v54, %v3389_v0  ;;  %v1025_v58 = vmax.f32 %v984_v51, 0.0 }
 0x2e9   : > { %v1026_v57 = vmax.f32 %v986_v53, 0.0 }
 0x2ea   : > { %v1027_v45 = vmax.f32 %v988_v55, 0.0 }
 0x2eb   : > { %v1077_v46 = vpack.c.bf16 %v1026_v57, %v1024_v56 }
 0x2ec   : > { %v1078_v59 = vpack.c.bf16 %v1027_v45, %v1025_v58  ;;  %v991_v60 = vpop.f32.mrb[44].mxu0  ;;  %v2965_v58 = vld [vmem:[%s3711_s2 + $0x58] sm:$0xff]  }
 0x2ed   : > { %v992_v61 = vadd.f32 %v991_v60, %v3385_v63  ;;  %v993_v62 = vpop.f32.mrb[45].mxu0 }
 0x2ee   : > { %v994_v1 = vadd.f32 %v993_v62, %v3389_v0  ;;  %v995_v2 = vpop.f32.mrb[46].mxu0  ;;  %1257 = vmatprep.mubr.bf16.mxu1 %v1078_v59 }
 0x2ef   : > { %v996_v3 = vadd.f32 %v995_v2, %v3385_v63  ;;  %v997_v4 = vpop.f32.mrb[47].mxu0  ;;  %1258 = vmatmul.mubr.bf16.gmra.mrb[56].mxu1 %v1077_v46  ;;  %v1028_v6 = vmax.f32 %v992_v61, 0.0  ;;  %v2957_v63 = vld [vmem:[%s3710_s1 + $0x330] ss:$8 sps:$4 sm:$0xff]   ;;  %v2966_v61 = vld [vmem:[%s3711_s2 + $0x60] sm:$0xff]  }
 0x2f0   : > { %v998_v5 = vadd.f32 %v997_v4, %v3389_v0  ;;  %v1029_v8 = vmax.f32 %v994_v1, 0.0  ;;  %2623 = vmatprep.subr.bf16.mxu0 %v2957_v63 }
 0x2f1   : > { %v1030_v7 = vmax.f32 %v996_v3, 0.0  ;;  %2624 = vmatpush3.bf16.msra.mxu0 %v2957_v63  ;;  %v2968_v63 = vld [vmem:[%s3711_s2 + $0x70] sm:$0xff]  }
 0x2f2   : > { %v1031_v9 = vmax.f32 %v998_v5, 0.0 }
 0x2f3   : > { %v1079_v10 = vpack.c.bf16 %v1030_v7, %v1028_v6  ;;  %v2967_v7 = vld [vmem:[%s3711_s2 + $0x68] sm:$0xff]  }
 0x2f4   : > { %v1080_v41 = vpack.c.bf16 %v1031_v9, %v1029_v8 }
 0x2f6   : > { %1265 = vmatprep.mubr.bf16.mxu1 %v1080_v41 }
 0x2f7   : > { %1266 = vmatmul.mubr.bf16.gmra.mrb[60].mxu1 %v1079_v10 }
 0x2f8   : > { %2665 = vmatprep.mubr.bf16.mxu1 %v3092_v14  ;;  %v2958_v14 = vld [vmem:[%s3710_s1 + $0x340] ss:$8 sps:$4 sm:$0xff]  }
 0x2f9   : > { %2625 = vmatprep.subr.bf16.mxu0 %v2958_v14 }
 0x2fa   : > { %2626 = vmatpush3.bf16.msra.mxu0 %v2958_v14 }
 0x2ff   : > { %2666 = vmatmul.mubr.bf16.vlgmr.msra.gmra.mrb[64].mxu1 %v3123_v27  ;;  %v2959_v27 = vld [vmem:[%s3710_s1 + $0x350] ss:$8 sps:$4 sm:$0xff]  }
 0x300   : > { %2669 = vmatprep.mubr.bf16.mxu1 %v3125_v28  ;;  %2627 = vmatprep.subr.bf16.mxu0 %v2959_v27  ;;  %v2960_v28 = vld [vmem:[%s3710_s1 + $0x360] ss:$8 sps:$4 sm:$0xff]  }
 0x301   : > { %2628 = vmatpush3.bf16.msra.mxu0 %v2959_v27 }
 0x302   : > { %2629 = vmatprep.subr.bf16.mxu0 %v2960_v28 }
 0x305   : > { %2630 = vmatpush3.bf16.msra.mxu0 %v2960_v28 }
 0x307   : > { %2670 = vmatmul.mubr.bf16.gmra.mrb[68].mxu1 %v3133_v33  ;;  %v2961_v33 = vld [vmem:[%s3710_s1 + $0x370] ss:$8 sps:$4 sm:$0xff]  }
 0x308   : > { %2673 = vmatprep.mubr.bf16.mxu1 %v3135_v34  ;;  %2631 = vmatprep.subr.bf16.mxu0 %v2961_v33  ;;  %v2962_v34 = vld [vmem:[%s3711_s2 + $0x40] sm:$0xff]  }
 0x309   : > { %2632 = vmatpush3.bf16.msra.mxu0 %v2961_v33 }
 0x30a   : > { %2681 = vmatprep.subr.bf16.mxu0 %v2962_v34 }
 0x30f   : > { %2674 = vmatmul.mubr.bf16.gmra.mrb[72].mxu1 %v3143_v39 }
 0x310   : > { %2677 = vmatprep.mubr.bf16.mxu1 %v3145_v40  ;;  %v3473_v40 = vld [vmem:[%s3712_s3 + $0x30] ss:$0 sm:$0xff] }
 0x317   : > { %2678 = vmatmul.mubr.bf16.gmra.mrb[76].mxu1 %v3151_v43 }
 0x392   : > { %v2457_v39 = vpop.f32.mrb[32].mxu1 }
 0x393   : > { %v2458_v43 = vpop.f32.mrb[33].mxu1 }
 0x394   : > { %v2459_v0 = vadd.f32 %v2458_v43, %v2457_v39  ;;  %v2460_v11 = vpop.f32.mrb[34].mxu1 }
 0x395   : > { %v2461_v12 = vpop.f32.mrb[35].mxu1 }
 0x396   : > { %v1212_v38 = vadd.f32 %v2459_v0, %v3473_v40  ;;  %v2462_v44 = vadd.f32 %v2461_v12, %v2460_v11  ;;  %v2969_v0 = vld [vmem:[%s3711_s2 + $0x78] sm:$0xff]  }
 0x398   : > { %v1215_v15 = vadd.f32 %v2462_v44, %v3473_v40  ;;  %v1274_v16 = vmax.f32 %v1212_v38, 0.0 }
 0x39a   : > { %v1275_v13 = vmax.f32 %v1215_v15, 0.0  ;;  %v2463_v17 = vpop.f32.mrb[36].mxu1 }
 0x39b   : > { %v2464_v18 = vpop.f32.mrb[37].mxu1 }
 0x39c   : > { %v2465_v19 = vadd.f32 %v2464_v18, %v2463_v17  ;;  %v2466_v48 = vpop.f32.mrb[38].mxu1  ;;  %v1307_v20 = vpack.c.bf16 %v1275_v13, %v1274_v16 }
 0x39d   : > { %v2467_v21 = vpop.f32.mrb[39].mxu1 }
 0x39e   : > { %v1220_v22 = vadd.f32 %v2465_v19, %v3473_v40  ;;  %v2468_v23 = vadd.f32 %v2467_v21, %v2466_v48  ;;  %2633 = vmatprep.mubr.bf16.mxu0 %v1307_v20 }
 0x3a0   : > { %v1223_v24 = vadd.f32 %v2468_v23, %v3473_v40  ;;  %v1276_v25 = vmax.f32 %v1220_v22, 0.0 }
 0x3a2   : > { %v1277_v26 = vmax.f32 %v1223_v24, 0.0  ;;  %v2469_v29 = vpop.f32.mrb[40].mxu1 }
 0x3a3   : > { %v2470_v30 = vpop.f32.mrb[41].mxu1 }
 0x3a4   : > { %v1308_v31 = vpack.c.bf16 %v1277_v26, %v1276_v25  ;;  %v2471_v32 = vadd.f32 %v2470_v30, %v2469_v29  ;;  %v2472_v35 = vpop.f32.mrb[42].mxu1 }
 0x3a5   : > { %v2473_v37 = vpop.f32.mrb[43].mxu1 }
 0x3a6   : > { %v1228_v42 = vadd.f32 %v2471_v32, %v3473_v40  ;;  %v2474_v47 = vadd.f32 %v2473_v37, %v2472_v35  ;;  %2634 = vmatmul.mubr.bf16.vlgmr.msra.gmra.mrb[48].mxu0 %v1308_v31 }
 0x3a7   : > { %2682 = vmatpush3.bf16.msra.mxu0 %v2962_v34 }
 0x3a8   : > { %v1231_v49 = vadd.f32 %v2474_v47, %v3473_v40  ;;  %2683 = vmatprep.subr.bf16.mxu0 %v2963_v36  ;;  %v1278_v51 = vmax.f32 %v1228_v42, 0.0  ;;  %v1476_v47 = vld [vmem:[%s3712_s3 + $0x50] ss:$0 sm:$0xff] }
 0x3aa   : > { %v1279_v52 = vmax.f32 %v1231_v49, 0.0  ;;  %v2475_v53 = vpop.f32.mrb[44].mxu1 }
 0x3ab   : > { %v2476_v54 = vpop.f32.mrb[45].mxu1  ;;  %2684 = vmatpush3.bf16.msra.mxu0 %v2963_v36 }
 0x3ac   : > { %v2477_v55 = vadd.f32 %v2476_v54, %v2475_v53  ;;  %v2478_v56 = vpop.f32.mrb[46].mxu1  ;;  %v1309_v57 = vpack.c.bf16 %v1279_v52, %v1278_v51  ;;  %2685 = vmatprep.subr.bf16.mxu0 %v2964_v50 }
 0x3ad   : > { %v2479_v45 = vpop.f32.mrb[47].mxu1 }
 0x3ae   : > { %v1236_v46 = vadd.f32 %v2477_v55, %v3473_v40  ;;  %v2480_v59 = vadd.f32 %v2479_v45, %v2478_v56  ;;  %2637 = vmatprep.mubr.bf16.mxu0 %v1309_v57 }
 0x3af   : > { %2686 = vmatpush3.bf16.msra.mxu0 %v2964_v50 }
 0x3b0   : > { %v1239_v60 = vadd.f32 %v2480_v59, %v3473_v40  ;;  %2687 = vmatprep.subr.bf16.mxu0 %v2965_v58  ;;  %v1280_v62 = vmax.f32 %v1236_v46, 0.0 }
 0x3b2   : > { %v1281_v1 = vmax.f32 %v1239_v60, 0.0  ;;  %v2481_v2 = vpop.f32.mrb[48].mxu1 }
 0x3b3   : > { %v2482_v3 = vpop.f32.mrb[49].mxu1  ;;  %2688 = vmatpush3.bf16.msra.mxu0 %v2965_v58 }
 0x3b4   : > { %v2483_v4 = vadd.f32 %v2482_v3, %v2481_v2  ;;  %v2484_v5 = vpop.f32.mrb[50].mxu1  ;;  %v1310_v6 = vpack.c.bf16 %v1281_v1, %v1280_v62  ;;  %2689 = vmatprep.subr.bf16.mxu0 %v2966_v61 }
 0x3b5   : > { %v2485_v8 = vpop.f32.mrb[51].mxu1 }
 0x3b6   : > { %v1244_v9 = vadd.f32 %v2483_v4, %v3473_v40  ;;  %v2486_v10 = vadd.f32 %v2485_v8, %v2484_v5  ;;  %2638 = vmatmul.mubr.bf16.gmra.mrb[52].mxu0 %v1310_v6 }
 0x3b7   : > { %2690 = vmatpush3.bf16.msra.mxu0 %v2966_v61 }
 0x3b8   : > { %v1247_v41 = vadd.f32 %v2486_v10, %v3473_v40  ;;  %2691 = vmatprep.subr.bf16.mxu0 %v2967_v7  ;;  %v1282_v14 = vmax.f32 %v1244_v9, 0.0 }
 0x3ba   : > { %v1283_v27 = vmax.f32 %v1247_v41, 0.0  ;;  %v2487_v28 = vpop.f32.mrb[52].mxu1 }
 0x3bb   : > { %v2488_v33 = vpop.f32.mrb[53].mxu1  ;;  %2692 = vmatpush3.bf16.msra.mxu0 %v2967_v7 }
 0x3bc   : > { %v2489_v34 = vadd.f32 %v2488_v33, %v2487_v28  ;;  %v2490_v39 = vpop.f32.mrb[54].mxu1  ;;  %v1311_v43 = vpack.c.bf16 %v1283_v27, %v1282_v14  ;;  %2693 = vmatprep.subr.bf16.mxu0 %v2968_v63 }
 0x3bd   : > { %v2491_v11 = vpop.f32.mrb[55].mxu1 }
 0x3be   : > { %v1252_v12 = vadd.f32 %v2489_v34, %v3473_v40  ;;  %v2492_v38 = vadd.f32 %v2491_v11, %v2490_v39  ;;  %2641 = vmatprep.mubr.bf16.mxu0 %v1311_v43 }
 0x3bf   : > { %2694 = vmatpush3.bf16.msra.mxu0 %v2968_v63 }
 0x3c0   : > { %v1255_v44 = vadd.f32 %v2492_v38, %v3473_v40  ;;  %2695 = vmatprep.subr.bf16.mxu0 %v2969_v0  ;;  %v1284_v15 = vmax.f32 %v1252_v12, 0.0 }
 0x3c2   : > { %v1285_v16 = vmax.f32 %v1255_v44, 0.0  ;;  %v2493_v13 = vpop.f32.mrb[56].mxu1 }
 0x3c3   : > { %v2494_v17 = vpop.f32.mrb[57].mxu1  ;;  %2696 = vmatpush3.bf16.msra.mxu0 %v2969_v0 }
 0x3c4   : > { %v2495_v18 = vadd.f32 %v2494_v17, %v2493_v13  ;;  %v2496_v19 = vpop.f32.mrb[58].mxu1  ;;  %v1312_v48 = vpack.c.bf16 %v1285_v16, %v1284_v15 }
 0x3c5   : > { %v2497_v20 = vpop.f32.mrb[59].mxu1 }
 0x3c6   : > { %v1260_v21 = vadd.f32 %v2495_v18, %v3473_v40  ;;  %v2498_v22 = vadd.f32 %v2497_v20, %v2496_v19  ;;  %2642 = vmatmul.mubr.bf16.gmra.mrb[56].mxu0 %v1312_v48 }
 0x3c8   : > { %v1263_v23 = vadd.f32 %v2498_v22, %v3473_v40  ;;  %v1286_v24 = vmax.f32 %v1260_v21, 0.0 }
 0x3ca   : > { %v1287_v25 = vmax.f32 %v1263_v23, 0.0  ;;  %v2499_v26 = vpop.f32.mrb[60].mxu1 }
 0x3cb   : > { %v2500_v29 = vpop.f32.mrb[61].mxu1 }
 0x3cc   : > { %v2501_v30 = vadd.f32 %v2500_v29, %v2499_v26  ;;  %v2502_v31 = vpop.f32.mrb[62].mxu1  ;;  %v1313_v32 = vpack.c.bf16 %v1287_v25, %v1286_v24 }
 0x3cd   : > { %v2503_v35 = vpop.f32.mrb[63].mxu1 }
 0x3ce   : > { %v1268_v36 = vadd.f32 %v2501_v30, %v3473_v40  ;;  %v2504_v37 = vadd.f32 %v2503_v35, %v2502_v31  ;;  %2645 = vmatprep.mubr.bf16.mxu0 %v1313_v32  ;;  %v2970_v35 = vld [vmem:[%s3711_s2 + $0x80] sm:$0xff]  }
 0x3cf   : > { %2713 = vmatprep.subr.bf16.mxu1 %v2970_v35 }
 0x3d0   : > { %v1271_v42 = vadd.f32 %v2504_v37, %v3473_v40  ;;  %v1288_v49 = vmax.f32 %v1268_v36, 0.0  ;;  %2714 = vmatpush3.bf16.msra.mxu1 %v2970_v35  ;;  %v2971_v36 = vld [vmem:[%s3711_s2 + $0x88] sm:$0xff]   ;;  %v2972_v37 = vld [vmem:[%s3711_s2 + $0x90] sm:$0xff]  }
 0x3d1   : > { %2715 = vmatprep.subr.bf16.mxu1 %v2971_v36 }
 0x3d2   : > { %v1289_v50 = vmax.f32 %v1271_v42, 0.0  ;;  %v2667_v51 = vpop.f32.mrb[64].mxu1  ;;  %v2973_v42 = vld [vmem:[%s3711_s2 + $0x98] sm:$0xff]  }
 0x3d3   : > { %v1568_v52 = vadd.f32 %v2667_v51, %v1476_v47  ;;  %v1559_v53 = vpop.f32.mrb[65].mxu1  ;;  %v2977_v51 = vld [vmem:[%s3711_s2 + $0xb8] sm:$0xff]  }
 0x3d4   : > { %v1560_v54 = vadd.f32 %v1559_v53, %v1476_v47  ;;  %v2668_v55 = vpop.f32.mrb[66].mxu1  ;;  %v1314_v56 = vpack.c.bf16 %v1289_v50, %v1288_v49  ;;  %2716 = vmatpush3.bf16.msra.mxu1 %v2971_v36  ;;  %v2975_v49 = vld [vmem:[%s3711_s2 + $0xa8] sm:$0xff]   ;;  %v2976_v50 = vld [vmem:[%s3711_s2 + $0xb0] sm:$0xff]  }
 0x3d5   : > { %v1624_v57 = vmax.f32 %v1568_v52, 0.0  ;;  %v1571_v58 = vadd.f32 %v2668_v55, %v1476_v47  ;;  %v1562_v45 = vpop.f32.mrb[67].mxu1  ;;  %2717 = vmatprep.subr.bf16.mxu1 %v2972_v37  ;;  %v2978_v52 = vld [vmem:[%s3711_s2 + $0xc0] sm:$0xff]   ;;  %v2979_v53 = vld [vmem:[%s3711_s2 + $0xc8] sm:$0xff]   ;;  %v3554_v55 = vld [vmem:[%s3711_s2 + $0xd8] sm:$0xff]  }
 0x3d6   : > { %v1563_v46 = vadd.f32 %v1562_v45, %v1476_v47  ;;  %2646 = vmatmul.mubr.bf16.gmra.mrb[60].mxu0 %v1314_v56  ;;  %v1622_v60 = vmax.f32 %v1560_v54, 0.0  ;;  %2745 = vmatprep.subr.bf16.mxu0 %v2978_v52  ;;  %v3548_v54 = vld [vmem:[%s3711_s2 + $0xd0] sm:$0xff]   ;;  %v3561_v56 = vld [vmem:[%s3711_s2 + $0xe0] sm:$0xff]  }
 0x3d7   : > { %v1625_v59 = vmax.f32 %v1571_v58, 0.0 }
 0x3d8   : > { %v1623_v40 = vmax.f32 %v1563_v46, 0.0  ;;  %2718 = vmatpush3.bf16.msra.mxu1 %v2972_v37 }
 0x3d9   : > { %v1656_v61 = vpack.c.bf16 %v1625_v59, %v1624_v57  ;;  %2719 = vmatprep.subr.bf16.mxu1 %v2973_v42  ;;  %v3568_v57 = vld [vmem:[%s3711_s2 + $0xe8] sm:$0xff]  }
 0x3da   : > { %v1655_v62 = vpack.c.bf16 %v1623_v40, %v1622_v60  ;;  %v2671_v1 = vpop.f32.mrb[68].mxu1 }
 0x3db   : > { %v1584_v2 = vadd.f32 %v2671_v1, %v1476_v47  ;;  %v1575_v3 = vpop.f32.mrb[69].mxu1  ;;  %v3592_v1 = vld [vmem:[%s3712_s3 + $0x60] ss:$0 sm:$0xff] }
 0x3dc   : > { %v1576_v4 = vadd.f32 %v1575_v3, %v1476_v47  ;;  %v2672_v5 = vpop.f32.mrb[70].mxu1  ;;  %2697 = vmatprep.mubr.bf16.mxu0 %v1655_v62  ;;  %2720 = vmatpush3.bf16.msra.mxu1 %v2973_v42 }
 0x3dd   : > { %v1628_v6 = vmax.f32 %v1584_v2, 0.0  ;;  %v1587_v7 = vadd.f32 %v2672_v5, %v1476_v47  ;;  %v1578_v8 = vpop.f32.mrb[71].mxu1 }
 0x3de   : > { %v1579_v9 = vadd.f32 %v1578_v8, %v1476_v47  ;;  %2698 = vmatmul.mubr.bf16.vlgmr.msra.gmra.mrb[64].mxu0 %v1656_v61  ;;  %v1626_v41 = vmax.f32 %v1576_v4, 0.0 }
 0x3df   : > { %v1629_v10 = vmax.f32 %v1587_v7, 0.0  ;;  %2746 = vmatpush3.bf16.msra.mxu0 %v2978_v52 }
 0x3e0   : > { %v1627_v63 = vmax.f32 %v1579_v9, 0.0  ;;  %2747 = vmatprep.subr.bf16.mxu0 %v2979_v53 }
 0x3e1   : > { %v1658_v14 = vpack.c.bf16 %v1629_v10, %v1628_v6 }
 0x3e2   : > { %v1657_v27 = vpack.c.bf16 %v1627_v63, %v1626_v41  ;;  %v2675_v28 = vpop.f32.mrb[72].mxu1 }
 0x3e3   : > { %v1600_v33 = vadd.f32 %v2675_v28, %v1476_v47  ;;  %v1591_v34 = vpop.f32.mrb[73].mxu1  ;;  %2748 = vmatpush3.bf16.msra.mxu0 %v2979_v53 }
 0x3e4   : > { %v1592_v39 = vadd.f32 %v1591_v34, %v1476_v47  ;;  %v2676_v43 = vpop.f32.mrb[74].mxu1  ;;  %2701 = vmatprep.mubr.bf16.mxu0 %v1657_v27  ;;  %2749 = vmatprep.subr.bf16.mxu0 %v3548_v54 }
 0x3e5   : > { %v1632_v0 = vmax.f32 %v1600_v33, 0.0  ;;  %v1603_v11 = vadd.f32 %v2676_v43, %v1476_v47  ;;  %v1594_v12 = vpop.f32.mrb[75].mxu1 }
 0x3e6   : > { %v1595_v38 = vadd.f32 %v1594_v12, %v1476_v47  ;;  %2702 = vmatmul.mubr.bf16.gmra.mrb[68].mxu0 %v1658_v14  ;;  %v1630_v15 = vmax.f32 %v1592_v39, 0.0 }
 0x3e7   : > { %v1633_v44 = vmax.f32 %v1603_v11, 0.0  ;;  %2750 = vmatpush3.bf16.msra.mxu0 %v3548_v54 }
 0x3e8   : > { %v1631_v16 = vmax.f32 %v1595_v38, 0.0  ;;  %2751 = vmatprep.subr.bf16.mxu0 %v3554_v55 }
 0x3e9   : > { %v1660_v13 = vpack.c.bf16 %v1633_v44, %v1632_v0 }
 0x3ea   : > { %v1659_v17 = vpack.c.bf16 %v1631_v16, %v1630_v15  ;;  %v2679_v18 = vpop.f32.mrb[76].mxu1 }
 0x3eb   : > { %v1616_v19 = vadd.f32 %v2679_v18, %v1476_v47  ;;  %v1607_v48 = vpop.f32.mrb[77].mxu1  ;;  %2752 = vmatpush3.bf16.msra.mxu0 %v3554_v55 }
 0x3ec   : > { %v1608_v20 = vadd.f32 %v1607_v48, %v1476_v47  ;;  %v2680_v21 = vpop.f32.mrb[78].mxu1  ;;  %2705 = vmatprep.mubr.bf16.mxu0 %v1659_v17  ;;  %2753 = vmatprep.subr.bf16.mxu0 %v3561_v56 }
 0x3ed   : > { %v1636_v22 = vmax.f32 %v1616_v19, 0.0  ;;  %v1619_v23 = vadd.f32 %v2680_v21, %v1476_v47  ;;  %v1610_v24 = vpop.f32.mrb[79].mxu1 }
 0x3ee   : > { %v1611_v25 = vadd.f32 %v1610_v24, %v1476_v47  ;;  %2706 = vmatmul.mubr.bf16.gmra.mrb[72].mxu0 %v1660_v13  ;;  %v1634_v29 = vmax.f32 %v1608_v20, 0.0  ;;  %v2974_v47 = vld [vmem:[%s3711_s2 + $0xa0] sm:$0xff]  }
 0x3ef   : > { %v1637_v26 = vmax.f32 %v1619_v23, 0.0  ;;  %2721 = vmatprep.subr.bf16.mxu1 %v2974_v47  ;;  %2754 = vmatpush3.bf16.msra.mxu0 %v3561_v56 }
 0x3f0   : > { %v1635_v30 = vmax.f32 %v1611_v25, 0.0  ;;  %2722 = vmatpush3.bf16.msra.mxu1 %v2974_v47  ;;  %2755 = vmatprep.subr.bf16.mxu0 %v3568_v57 }
 0x3f1   : > { %v1662_v31 = vpack.c.bf16 %v1637_v26, %v1636_v22  ;;  %2723 = vmatprep.subr.bf16.mxu1 %v2975_v49 }
 0x3f2   : > { %v1661_v32 = vpack.c.bf16 %v1635_v30, %v1634_v29 }
 0x3f3   : > { %2756 = vmatpush3.bf16.msra.mxu0 %v3568_v57 }
 0x3f4   : > { %2709 = vmatprep.mubr.bf16.mxu0 %v1661_v32  ;;  %2724 = vmatpush3.bf16.msra.mxu1 %v2975_v49 }
 0x3f5   : > { %2725 = vmatprep.subr.bf16.mxu1 %v2976_v50 }
 0x3f6   : > { %2710 = vmatmul.mubr.bf16.gmra.mrb[76].mxu0 %v1662_v31 }
 0x3f8   : > { %2726 = vmatpush3.bf16.msra.mxu1 %v2976_v50 }
 0x3f9   : > { %2727 = vmatprep.subr.bf16.mxu1 %v2977_v51 }
 0x3fc   : > { %2728 = vmatpush3.bf16.msra.mxu1 %v2977_v51 }
 0x3fd   : > { %2777 = vmatprep.subr.bf16.mxu1 %v2978_v52 }
 0x499   : > { %v3573_v58 = vpop.f32.mrb[56].mxu0 }
 0x49a   : > { %v3575_v45 = vpop.f32.mrb[57].mxu0 }
 0x49b   : > { %v3577_v46 = vpop.f32.mrb[58].mxu0 }
 0x49c   : > { %v3579_v59 = vpop.f32.mrb[59].mxu0 }
 0x4a9   : > { %v3581_v60 = vpop.f32.mrb[60].mxu0 }
 0x4aa   : > { %v3583_v40 = vpop.f32.mrb[61].mxu0 }
 0x4ab   : > { %v3585_v61 = vpop.f32.mrb[62].mxu0 }
 0x4ac   : > { %v3587_v62 = vpop.f32.mrb[63].mxu0 }
 0x4b1   : > { %v2699_v2 = vpop.f32.mrb[64].mxu0 }
 0x4b2   : > { %v1754_v3 = vadd.f32 %v2699_v2, %v3592_v1  ;;  %v1745_v4 = vpop.f32.mrb[65].mxu0 }
 0x4b3   : > { %v1746_v5 = vadd.f32 %v1745_v4, %v3592_v1  ;;  %v2700_v6 = vpop.f32.mrb[66].mxu0 }
 0x4b4   : > { %v1757_v7 = vadd.f32 %v2700_v6, %v3592_v1  ;;  %v1748_v8 = vpop.f32.mrb[67].mxu0  ;;  %v1810_v10 = vmax.f32 %v1754_v3, 0.0 }
 0x4b5   : > { %v1749_v9 = vadd.f32 %v1748_v8, %v3592_v1  ;;  %v1808_v63 = vmax.f32 %v1746_v5, 0.0  ;;  %v2984_v5 = vld [vmem:[%s3711_s2 + $0xf0] sm:$0xff]  }
 0x4b6   : > { %v1811_v41 = vmax.f32 %v1757_v7, 0.0  ;;  %2757 = vmatprep.subr.bf16.mxu0 %v2984_v5 }
 0x4b7   : > { %v1809_v14 = vmax.f32 %v1749_v9, 0.0  ;;  %2758 = vmatpush3.bf16.msra.mxu0 %v2984_v5 }
 0x4b8   : > { %v1842_v27 = vpack.c.bf16 %v1811_v41, %v1810_v10 }
 0x4b9   : > { %v1841_v28 = vpack.c.bf16 %v1809_v14, %v1808_v63  ;;  %v2703_v33 = vpop.f32.mrb[68].mxu0 }
 0x4ba   : > { %v1770_v34 = vadd.f32 %v2703_v33, %v3592_v1  ;;  %v1761_v39 = vpop.f32.mrb[69].mxu0 }
 0x4bb   : > { %v1762_v43 = vadd.f32 %v1761_v39, %v3592_v1  ;;  %v2704_v0 = vpop.f32.mrb[70].mxu0  ;;  %2729 = vmatprep.mubr.bf16.mxu1 %v1841_v28 }
 0x4bc   : > { %v1773_v11 = vadd.f32 %v2704_v0, %v3592_v1  ;;  %v1764_v12 = vpop.f32.mrb[71].mxu0  ;;  %2730 = vmatmul.mubr.bf16.vlgmr.msra.gmra.mrb[80].mxu1 %v1842_v27  ;;  %v1814_v44 = vmax.f32 %v1770_v34, 0.0 }
 0x4bd   : > { %v1765_v38 = vadd.f32 %v1764_v12, %v3592_v1  ;;  %2785 = vmatpush3.bf16.msra.mxu1 %v2978_v52  ;;  %v1812_v16 = vmax.f32 %v1762_v43, 0.0 }
 0x4be   : > { %v1815_v15 = vmax.f32 %v1773_v11, 0.0  ;;  %2778 = vmatprep.subr.bf16.mxu1 %v2979_v53 }
 0x4bf   : > { %v1813_v13 = vmax.f32 %v1765_v38, 0.0 }
 0x4c0   : > { %v1844_v17 = vpack.c.bf16 %v1815_v15, %v1814_v44 }
 0x4c1   : > { %v1843_v18 = vpack.c.bf16 %v1813_v13, %v1812_v16  ;;  %v2707_v19 = vpop.f32.mrb[72].mxu0  ;;  %2786 = vmatpush3.bf16.msra.mxu1 %v2979_v53 }
 0x4c2   : > { %v1786_v48 = vadd.f32 %v2707_v19, %v3592_v1  ;;  %v1777_v20 = vpop.f32.mrb[73].mxu0  ;;  %2779 = vmatprep.subr.bf16.mxu1 %v3548_v54 }
 0x4c3   : > { %v1778_v21 = vadd.f32 %v1777_v20, %v3592_v1  ;;  %v2708_v22 = vpop.f32.mrb[74].mxu0  ;;  %2733 = vmatprep.mubr.bf16.mxu1 %v1843_v18 }
 0x4c4   : > { %v1789_v23 = vadd.f32 %v2708_v22, %v3592_v1  ;;  %v1780_v24 = vpop.f32.mrb[75].mxu0  ;;  %2734 = vmatmul.mubr.bf16.gmra.mrb[84].mxu1 %v1844_v17  ;;  %v1818_v26 = vmax.f32 %v1786_v48, 0.0 }
 0x4c5   : > { %v1781_v25 = vadd.f32 %v1780_v24, %v3592_v1  ;;  %2787 = vmatpush3.bf16.msra.mxu1 %v3548_v54  ;;  %v1816_v30 = vmax.f32 %v1778_v21, 0.0 }
 0x4c6   : > { %v1819_v29 = vmax.f32 %v1789_v23, 0.0  ;;  %2780 = vmatprep.subr.bf16.mxu1 %v3554_v55 }
 0x4c7   : > { %v1817_v31 = vmax.f32 %v1781_v25, 0.0 }
 0x4c8   : > { %v1846_v32 = vpack.c.bf16 %v1819_v29, %v1818_v26 }
 0x4c9   : > { %v1845_v35 = vpack.c.bf16 %v1817_v31, %v1816_v30  ;;  %v2711_v36 = vpop.f32.mrb[76].mxu0  ;;  %2788 = vmatpush3.bf16.msra.mxu1 %v3554_v55 }
 0x4ca   : > { %v1802_v37 = vadd.f32 %v2711_v36, %v3592_v1  ;;  %v1793_v42 = vpop.f32.mrb[77].mxu0  ;;  %2781 = vmatprep.subr.bf16.mxu1 %v3561_v56 }
 0x4cb   : > { %v1794_v47 = vadd.f32 %v1793_v42, %v3592_v1  ;;  %v2712_v49 = vpop.f32.mrb[78].mxu0  ;;  %2737 = vmatprep.mubr.bf16.mxu1 %v1845_v35 }
 0x4cc   : > { %v1805_v50 = vadd.f32 %v2712_v49, %v3592_v1  ;;  %v1796_v51 = vpop.f32.mrb[79].mxu0  ;;  %2738 = vmatmul.mubr.bf16.gmra.mrb[88].mxu1 %v1846_v32  ;;  %v1822_v53 = vmax.f32 %v1802_v37, 0.0 }
 0x4cd   : > { %v1797_v52 = vadd.f32 %v1796_v51, %v3592_v1  ;;  %2789 = vmatpush3.bf16.msra.mxu1 %v3561_v56  ;;  %v1820_v55 = vmax.f32 %v1794_v47, 0.0  ;;  %v2985_v56 = vld [vmem:[%s3711_s2 + $0xf8] sm:$0xff]  }
 0x4ce   : > { %v1823_v54 = vmax.f32 %v1805_v50, 0.0  ;;  %2782 = vmatprep.subr.bf16.mxu1 %v3568_v57  ;;  %2759 = vmatprep.subr.bf16.mxu0 %v2985_v56 }
 0x4cf   : > { %v1821_v2 = vmax.f32 %v1797_v52, 0.0  ;;  %2760 = vmatpush3.bf16.msra.mxu0 %v2985_v56 }
 0x4d0   : > { %v1848_v3 = vpack.c.bf16 %v1823_v54, %v1822_v53 }
 0x4d1   : > { %v1847_v4 = vpack.c.bf16 %v1821_v2, %v1820_v55  ;;  %2790 = vmatpush3.bf16.msra.mxu1 %v3568_v57  ;;  %v1840_v57 = vld [vmem:[%s3712_s3 + $0x70] ss:$0 sm:$0xff] }
 0x4d2   : > { %2783 = vmatprep.subr.bf16.mxu1 %v2984_v5 }
 0x4d3   : > { %2741 = vmatprep.mubr.bf16.mxu1 %v1847_v4 }
 0x4d4   : > { %2742 = vmatmul.mubr.bf16.gmra.mrb[92].mxu1 %v1848_v3 }
 0x4d5   : > { %2791 = vmatpush3.bf16.msra.mxu1 %v2984_v5 }
 0x4d6   : > { %2784 = vmatprep.subr.bf16.mxu1 %v2985_v56 }
 0x4d9   : > { %2792 = vmatpush3.bf16.msra.mxu1 %v2985_v56 }
 0x58f   : > { %v2731_v1 = vpop.f32.mrb[80].mxu1 }
 0x590   : > { %v1940_v6 = vadd.f32 %v2731_v1, %v1840_v57  ;;  %v1931_v7 = vpop.f32.mrb[81].mxu1 }
 0x591   : > { %v1932_v8 = vadd.f32 %v1931_v7, %v1840_v57  ;;  %v2732_v9 = vpop.f32.mrb[82].mxu1 }
 0x592   : > { %v1943_v10 = vadd.f32 %v2732_v9, %v1840_v57  ;;  %v1934_v41 = vpop.f32.mrb[83].mxu1  ;;  %v1996_v14 = vmax.f32 %v1940_v6, 0.0  ;;  %v3630_v6 = vld [vmem:[%s3712_s3 + $0x40] ss:$0 sm:$0xff]  ;;  %v2986_v9 = vld [vmem:[%s3082_s16 + $0x10] sm:$0xff] }
 0x593   : > { %v1935_v63 = vadd.f32 %v1934_v41, %v1840_v57  ;;  %v1994_v28 = vmax.f32 %v1932_v8, 0.0 }
 0x594   : > { %v1997_v27 = vmax.f32 %v1943_v10, 0.0  ;;  %v2198_v10 = vmul.f32 0.1, %v2986_v9 }
 0x595   : > { %v1995_v33 = vmax.f32 %v1935_v63, 0.0 }
 0x596   : > { %v2028_v34 = vpack.c.bf16 %v1997_v27, %v1996_v14  ;;  %v2987_v14 = vld [vmem:[%s3082_s16 + $0x18] sm:$0xff] }
 0x597   : > { %v2027_v39 = vpack.c.bf16 %v1995_v33, %v1994_v28  ;;  %v2735_v43 = vpop.f32.mrb[84].mxu1  ;;  %v2199_v27 = vmul.f32 0.1, %v2987_v14  ;;  %v2988_v28 = vld [vmem:[%s3082_s16] sm:$0xff]  ;;  %v1454_v14 = vadd.f32 %v3581_v60, %v3630_v6 }
 0x598   : > { %v1956_v0 = vadd.f32 %v2735_v43, %v1840_v57  ;;  %v1947_v11 = vpop.f32.mrb[85].mxu1  ;;  %v2196_v33 = vmul.f32 0.1, %v2988_v28 }
 0x599   : > { %v1948_v12 = vadd.f32 %v1947_v11, %v1840_v57  ;;  %v2736_v38 = vpop.f32.mrb[86].mxu1  ;;  %2761 = vmatprep.mubr.bf16.mxu0 %v2027_v39 }
 0x59a   : > { %v1959_v44 = vadd.f32 %v2736_v38, %v1840_v57  ;;  %v1950_v15 = vpop.f32.mrb[87].mxu1  ;;  %2762 = vmatmul.mubr.bf16.vlgmr.msra.gmra.mrb[48].mxu0 %v2028_v34  ;;  %v2000_v13 = vmax.f32 %v1956_v0, 0.0  ;;  %v2989_v34 = vld [vmem:[%s3082_s16 + $0x8] sm:$0xff] }
 0x59b   : > { %v1951_v16 = vadd.f32 %v1950_v15, %v1840_v57  ;;  %v1998_v18 = vmax.f32 %v1948_v12, 0.0  ;;  %v2197_v39 = vmul.f32 0.1, %v2989_v34  ;;  %v1446_v34 = vadd.f32 %v3583_v40, %v3630_v6 }
 0x59c   : > { %v2001_v17 = vmax.f32 %v1959_v44, 0.0 }
 0x59d   : > { %v1999_v19 = vmax.f32 %v1951_v16, 0.0 }
 0x59e   : > { %v2030_v48 = vpack.c.bf16 %v2001_v17, %v2000_v13 }
 0x59f   : > { %v2029_v20 = vpack.c.bf16 %v1999_v19, %v1998_v18  ;;  %v2739_v21 = vpop.f32.mrb[88].mxu1  ;;  %v2990_v19 = vld [vmem:[%s3082_s16 + $0x30] sm:$0xff] }
 0x5a0   : > { %v1972_v22 = vadd.f32 %v2739_v21, %v1840_v57  ;;  %v1963_v23 = vpop.f32.mrb[89].mxu1  ;;  %v2991_v21 = vld [vmem:[%s3082_s16 + $0x20] sm:$0xff] }
 0x5a1   : > { %v1964_v24 = vadd.f32 %v1963_v23, %v1840_v57  ;;  %v2740_v25 = vpop.f32.mrb[90].mxu1  ;;  %2765 = vmatprep.mubr.bf16.mxu0 %v2029_v20 }
 0x5a2   : > { %v1975_v26 = vadd.f32 %v2740_v25, %v1840_v57  ;;  %v1966_v29 = vpop.f32.mrb[91].mxu1  ;;  %2766 = vmatmul.mubr.bf16.gmra.mrb[52].mxu0 %v2030_v48  ;;  %v2004_v31 = vmax.f32 %v1972_v22, 0.0  ;;  %v2202_v48 = vmul.f32 0.1, %v2990_v19  ;;  %v2200_v22 = vmul.f32 0.1, %v2991_v21 }
 0x5a3   : > { %v1967_v30 = vadd.f32 %v1966_v29, %v1840_v57  ;;  %v2002_v35 = vmax.f32 %v1964_v24, 0.0  ;;  %v2992_v25 = vld [vmem:[%s3082_s16 + $0x38] sm:$0xff] }
 0x5a4   : > { %v2005_v32 = vmax.f32 %v1975_v26, 0.0  ;;  %v2203_v26 = vmul.f32 0.1, %v2992_v25 }
 0x5a5   : > { %v2003_v36 = vmax.f32 %v1967_v30, 0.0 }
 0x5a6   : > { %v2032_v37 = vpack.c.bf16 %v2005_v32, %v2004_v31  ;;  %v2993_v31 = vld [vmem:[%s3082_s16 + $0x28] sm:$0xff] }
 0x5a7   : > { %v2031_v42 = vpack.c.bf16 %v2003_v36, %v2002_v35  ;;  %v2743_v47 = vpop.f32.mrb[92].mxu1  ;;  %v2201_v32 = vmul.f32 0.1, %v2993_v31  ;;  %v1438_v35 = vadd.f32 %v3573_v58, %v3630_v6 }
 0x5a8   : > { %v1988_v49 = vadd.f32 %v2743_v47, %v1840_v57  ;;  %v1979_v50 = vpop.f32.mrb[93].mxu1  ;;  %v1430_v47 = vadd.f32 %v3575_v45, %v3630_v6 }
 0x5a9   : > { %v1980_v51 = vadd.f32 %v1979_v50, %v1840_v57  ;;  %v2744_v52 = vpop.f32.mrb[94].mxu1  ;;  %2769 = vmatprep.mubr.bf16.mxu1 %v2031_v42 }
 0x5aa   : > { %v1991_v53 = vadd.f32 %v2744_v52, %v1840_v57  ;;  %v1982_v54 = vpop.f32.mrb[95].mxu1  ;;  %2770 = vmatmul.mubr.bf16.vlgmr.msra.gmra.mrb[96].mxu1 %v2032_v37  ;;  %v2008_v2 = vmax.f32 %v1988_v49, 0.0 }
 0x5ab   : > { %v1983_v55 = vadd.f32 %v1982_v54, %v1840_v57  ;;  %v2006_v4 = vmax.f32 %v1980_v51, 0.0  ;;  %v3635_v57 = vld [vmem:[%s3712_s3 + $0x80] ss:$0 sm:$0xff]  ;;  %v1441_v51 = vadd.f32 %v3577_v46, %v3630_v6 }
 0x5ac   : > { %v2009_v3 = vmax.f32 %v1991_v53, 0.0  ;;  %v2799_v7 = vadd.f32 %v3635_v57, %v3630_v6  ;;  %v1433_v53 = vadd.f32 %v3579_v59, %v3630_v6  ;;  %v2810_v54 = vadd.f32 %v3635_v57, %v1438_v35  ;;  %v2996_v59 = vld [vmem:[%s3082_s16 + $0x58] sm:$0xff] }
 0x5ad   : > { %v2007_v5 = vmax.f32 %v1983_v55, 0.0  ;;  %v2994_v55 = vld [vmem:[%s3082_s16 + $0x50] sm:$0xff] }
 0x5ae   : > { %v2034_v56 = vpack.c.bf16 %v2009_v3, %v2008_v2  ;;  %v2206_v45 = vmul.f32 0.1, %v2994_v55  ;;  %v2813_v3 = vadd.f32 %v3635_v57, %v1430_v47 }
 0x5af   : > { %v2033_v1 = vpack.c.bf16 %v2007_v5, %v2006_v4  ;;  %v2995_v4 = vld [vmem:[%s3082_s16 + $0x40] sm:$0xff] }
 0x5b0   : > { %v2204_v46 = vmul.f32 0.1, %v2995_v4 }
 0x5b1   : > { %2773 = vmatprep.mubr.bf16.mxu1 %v2033_v1  ;;  %v2816_v1 = vadd.f32 %v3635_v57, %v1441_v51 }
 0x5b2   : > { %2774 = vmatmul.mubr.bf16.gmra.mrb[100].mxu1 %v2034_v56 }
 0x66d   : > { %v2763_v8 = vpop.f32.mrb[48].mxu0 }
 0x66e   : > { %v2793_v41 = vadd.f32 %v2763_v8, %v3630_v6  ;;  %v2117_v63 = vpop.f32.mrb[49].mxu0 }
 0x66f   : > { %v2795_v43 = vadd.f32 %v2117_v63, %v3630_v6  ;;  %v2764_v0 = vpop.f32.mrb[50].mxu0 }
 0x670   : > { %v2794_v11 = vadd.f32 %v2793_v41, %v3635_v57  ;;  %v2798_v12 = vadd.f32 %v2799_v7, %v2764_v0  ;;  %v2120_v38 = vpop.f32.mrb[51].mxu0  ;;  %v2997_v41 = vld [vmem:[%s3082_s16 + $0x48] sm:$0xff]  ;;  %v1457_v0 = vadd.f32 %v3585_v61, %v3630_v6 }
 0x671   : > { %v2796_v44 = vadd.f32 %v2795_v43, %v3635_v57  ;;  %v2800_v15 = vadd.f32 %v2799_v7, %v2120_v38  ;;  %v2205_v63 = vmul.f32 0.1, %v2997_v41  ;;  %v2822_v38 = vadd.f32 %v3635_v57, %v1454_v14 }
 0x672   : > { %v2214_v16 = vsub.f32 %v2794_v11, %v2198_v10  ;;  %v2215_v13 = vsub.f32 %v2798_v12, %v2199_v27  ;;  %v2819_v10 = vadd.f32 %v3635_v57, %v1433_v53  ;;  %v1449_v12 = vadd.f32 %v3587_v62, %v3630_v6  ;;  %v3000_v6 = vld [vmem:[%s3082_s16 + $0x78] sm:$0xff] }
 0x673   : > { %v2212_v17 = vsub.f32 %v2796_v44, %v2196_v33  ;;  %v2213_v18 = vsub.f32 %v2800_v15, %v2197_v39  ;;  %v2998_v44 = vld [vmem:[%s3082_s16 + $0x70] sm:$0xff]  ;;  %v2828_v62 = vadd.f32 %v3635_v57, %v1457_v0  ;;  %v2211_v19 = vmul.f32 0.1, %v3000_v6 }
 0x674   : > { %2230 = vst [vmem:[%s3651_s21 + $0x10] sm:$0xff] %v2214_v16  ;;  %2231 = vst [vmem:[%s3651_s21 + $0x18] sm:$0xff] %v2215_v13  ;;  %v2210_v40 = vmul.f32 0.1, %v2998_v44  ;;  %v2825_v16 = vadd.f32 %v3635_v57, %v1446_v34  ;;  %v2999_v13 = vld [vmem:[%s3082_s16 + $0x60] sm:$0xff]  ;;  %v2831_v21 = vadd.f32 %v3635_v57, %v1449_v12 }
 0x675   : > { %2228 = vst [vmem:[%s3651_s21] sm:$0xff] %v2212_v17  ;;  %2229 = vst [vmem:[%s3651_s21 + $0x8] sm:$0xff] %v2213_v18  ;;  %v2767_v20 = vpop.f32.mrb[52].mxu0  ;;  %v2208_v61 = vmul.f32 0.1, %v2999_v13 }
 0x676   : > { %v2802_v23 = vadd.f32 %v2799_v7, %v2767_v20  ;;  %v2133_v24 = vpop.f32.mrb[53].mxu0 }
 0x677   : > { %v2804_v29 = vadd.f32 %v2799_v7, %v2133_v24  ;;  %v2768_v30 = vpop.f32.mrb[54].mxu0 }
 0x678   : > { %v2218_v36 = vsub.f32 %v2802_v23, %v2202_v48  ;;  %v2806_v37 = vadd.f32 %v2799_v7, %v2768_v30  ;;  %v2136_v42 = vpop.f32.mrb[55].mxu0 }
 0x679   : > { %v2216_v49 = vsub.f32 %v2804_v29, %v2200_v22  ;;  %v2808_v50 = vadd.f32 %v2799_v7, %v2136_v42  ;;  %v2207_v7 = vmul.f32 0.1, %v2996_v59  ;;  %v3001_v22 = vld [vmem:[%s3082_s16 + $0x68] sm:$0xff] }
 0x67a   : > { %2234 = vst [vmem:[%s3651_s21 + $0x30] sm:$0xff] %v2218_v36  ;;  %v2219_v52 = vsub.f32 %v2806_v37, %v2203_v26  ;;  %v2209_v23 = vmul.f32 0.1, %v3001_v22 }
 0x67b   : > { %2232 = vst [vmem:[%s3651_s21 + $0x20] sm:$0xff] %v2216_v49  ;;  %v2217_v58 = vsub.f32 %v2808_v50, %v2201_v32 }
 0x67c   : > { %2235 = vst [vmem:[%s3651_s21 + $0x38] sm:$0xff] %v2219_v52 }
 0x67d   : > { %2233 = vst [vmem:[%s3651_s21 + $0x28] sm:$0xff] %v2217_v58  ;;  %v2771_v2 = vpop.f32.mrb[96].mxu1 }
 0x67e   : > { %v2811_v5 = vadd.f32 %v2810_v54, %v2771_v2  ;;  %v2149_v56 = vpop.f32.mrb[97].mxu1 }
 0x67f   : > { %v2814_v8 = vadd.f32 %v2813_v3, %v2149_v56  ;;  %v2772_v9 = vpop.f32.mrb[98].mxu1 }
 0x680   : > { %v2222_v27 = vsub.f32 %v2811_v5, %v2206_v45  ;;  %v2817_v28 = vadd.f32 %v2816_v1, %v2772_v9  ;;  %v2152_v33 = vpop.f32.mrb[99].mxu1 }
 0x681   : > { %v2220_v39 = vsub.f32 %v2814_v8, %v2204_v46  ;;  %v2820_v43 = vadd.f32 %v2819_v10, %v2152_v33 }
 0x682   : > { %2238 = vst [vmem:[%s3651_s21 + $0x50] sm:$0xff] %v2222_v27  ;;  %v2223_v11 = vsub.f32 %v2817_v28, %v2207_v7 }
 0x683   : > { %2236 = vst [vmem:[%s3651_s21 + $0x40] sm:$0xff] %v2220_v39  ;;  %v2221_v60 = vsub.f32 %v2820_v43, %v2205_v63 }
 0x684   : > { %2239 = vst [vmem:[%s3651_s21 + $0x58] sm:$0xff] %v2223_v11 }
 0x685   : > { %2237 = vst [vmem:[%s3651_s21 + $0x48] sm:$0xff] %v2221_v60  ;;  %v2775_v15 = vpop.f32.mrb[100].mxu1 }
 0x686   : > { %v2823_v17 = vadd.f32 %v2822_v38, %v2775_v15  ;;  %v2165_v18 = vpop.f32.mrb[101].mxu1 }
 0x687   : > { %v2826_v48 = vadd.f32 %v2825_v16, %v2165_v18  ;;  %v2776_v20 = vpop.f32.mrb[102].mxu1 }
 0x688   : > { %v2226_v24 = vsub.f32 %v2823_v17, %v2210_v40  ;;  %v2829_v25 = vadd.f32 %v2828_v62, %v2776_v20  ;;  %v2168_v26 = vpop.f32.mrb[103].mxu1 }
 0x689   : > { %v2224_v29 = vsub.f32 %v2826_v48, %v2208_v61  ;;  %v2832_v30 = vadd.f32 %v2831_v21, %v2168_v26 }
 0x68a   : > { %2242 = vst [vmem:[%s3651_s21 + $0x70] sm:$0xff] %v2226_v24  ;;  %v2227_v31 = vsub.f32 %v2829_v25, %v2211_v19 }
 0x68b   : > { %2240 = vst [vmem:[%s3651_s21 + $0x60] sm:$0xff] %v2224_v29  ;;  %v2225_v32 = vsub.f32 %v2832_v30, %v2209_v23 }
 0x68c   : > { %2243 = vst [vmem:[%s3651_s21 + $0x78] sm:$0xff] %v2227_v31 }
 0x68d   : > { %2241 = vst [vmem:[%s3651_s21 + $0x68] sm:$0xff] %v2225_v32 }
 0x68e PF: > { %s14_s15 = sadd.s32 1, %s3008_s15  }
 0x68f   : > { %p11_p4 = scmp.ge.s32.totalorder %s14_s15, 6  }
 0x691   :  { %13 = sbr.rel (!%p11_p4) target bundleno = 1 (0x1), region = 68 }

</bundles_post_ra>
